<compile_context>
chip_gen: v7x
topology: tpu7x:2x2x1
jax: 0.10.0
libtpu: 0.0.40
codegen_flags: <defaults>
</compile_context>

<pallas_src>
import functools

import jax
import jax.numpy as jnp
import numpy as np
from jax.experimental import pallas as pl
from jax.experimental.pallas import tpu as pltpu


def _subsample_kernel(x00, x01, x02, x03, x10, x11, x12, x13,
                      w1_ref, b1_ref, w2_ref, b2_ref,
                      out_ref,
                      h1e_ref, h1o_ref, p_ref, y_ref,
                      *, T1, T2, D2, D2p, C):
    xs = ((x00, x01, x02, x03), (x10, x11, x12, x13))
    W1 = D2 + 1                       # width of each h1 width-parity plane

    # ---- conv1: 1 -> C, 3x3, stride 2, valid, + ReLU (VPU elementwise) -----
    # Written directly into two width-parity planes so every conv2 tap below
    # is a contiguous slice. Bias folded into the first tap, ReLU into the
    # last tap; accumulation goes straight into the VMEM ref.
    for r, href in ((0, h1e_ref), (1, h1o_ref)):
        for kh in range(3):
            for kw in range(3):
                s = 2 * r + kw
                # x[2*t1 + kh, 4*j + 2*r + kw]  as a contiguous slice of the
                # (time % 2, width % 4) parity plane -> (T1, W1), lane = width.
                patch = xs[kh % 2][s % 4][pl.ds(kh // 2, T1),
                                          pl.ds(s // 4, W1)]
                contrib = patch[:, :, None] * w1_ref[kh * 3 + kw][None, None, :]
                if kh == 0 and kw == 0:
                    href[...] = contrib + b1_ref[...]
                elif kh == 2 and kw == 2:
                    href[...] = jnp.maximum(href[...] + contrib, 0.0)
                else:
                    href[...] = href[...] + contrib

    # ---- conv2: C -> C, 3x3, stride 2, valid, + ReLU (fused im2col matmul) -
    # P[t2, d2, tap*C + cin] = relu(h1)[2*t2 + kh, 2*d2 + kw, cin]
    # Each tap is a contiguous (lane-full) slice of an h1 parity plane; only
    # the leading (time) dim is strided. Pad sublanes [D2:D2p) are never read
    # back (their matmul rows are discarded).
    for kh in range(3):
        for kw in range(3):
            tap = kh * 3 + kw
            href = h1e_ref if kw % 2 == 0 else h1o_ref
            p_ref[:, pl.ds(0, D2), pl.ds(tap * C, C)] = (
                href[pl.ds(kh, T2, 2), pl.ds(kw // 2, D2), :])

    # Single MXU matmul with K = 9*C (reshapes below are lane-preserving and
    # 8-aligned on the sublane dim, hence layout-compatible).
    y = jnp.dot(p_ref[...].reshape(T2 * D2p, 9 * C), w2_ref[...],
                preferred_element_type=jnp.float32)                # (T2*D2p, C)
    y_ref[...] = jnp.maximum(y + b2_ref[...], 0.0).reshape(T2, D2p, C)

    # Final (d2, c) -> (c, d2) permute per output frame, done in-kernel so the
    # wrapper only needs a free metadata reshape to (B, T2, C*D2).
    def _store_row(i, carry):
        out_ref[i] = y_ref[i, pl.ds(0, D2), :].T                   # (C, D2)
        return carry

    jax.lax.fori_loop(0, T2, _store_row, 0)


def conv2d_subsampling(inputs, input_lengths, params):
    B, T, D = inputs.shape
    C = params["w1"].shape[0]
    T1 = (T - 3) // 2 + 1
    D1 = (D - 3) // 2 + 1
    T2 = (T1 - 3) // 2 + 1
    D2 = (D1 - 3) // 2 + 1
    D2p = ((D2 + 7) // 8) * 8          # pad D2 to a sublane multiple
    W1 = D2 + 1                        # h1 parity-plane width
    Wx = D2 + 2                        # x parity-plane width

    # ---- layout glue (plain JAX, cheap; x is tiny compared to h1) ----------
    # Deinterleave x by (time % 2, width % 4) so every conv1 tap in the kernel
    # is a contiguous, lane-dense slice. Zero-padding only feeds plane slots
    # that the valid conv outputs never read.
    t_pad = 2 * (T1 + 1) - T
    d_pad = 4 * Wx - D
    xpad = jnp.pad(inputs, ((0, 0), (0, t_pad), (0, d_pad)))
    xplanes = [xpad[:, a::2, b::4][:, :T1 + 1, :Wx]
               for a in range(2) for b in range(4)]

    w1 = params["w1"].reshape(C, 9).T                                  # (9, C)
    b1 = params["b1"].reshape(1, 1, C)
    w2 = jnp.transpose(params["w2"], (2, 3, 1, 0)).reshape(9 * C, C)   # (9C, C)
    b2 = params["b2"].reshape(1, C)

    kernel = functools.partial(_subsample_kernel,
                               T1=T1, T2=T2, D2=D2, D2p=D2p, C=C)

    plane_spec = pl.BlockSpec((None, T1 + 1, Wx), lambda b: (b, 0, 0))
    out4 = pl.pallas_call(
        kernel,
        out_shape=jax.ShapeDtypeStruct((B, T2, C, D2), jnp.float32),
        grid=(B,),
        in_specs=[plane_spec] * 8 + [
            pl.BlockSpec((9, C), lambda b: (0, 0)),
            pl.BlockSpec((1, 1, C), lambda b: (0, 0, 0)),
            pl.BlockSpec((9 * C, C), lambda b: (0, 0)),
            pl.BlockSpec((1, C), lambda b: (0, 0)),
        ],
        out_specs=pl.BlockSpec((None, T2, C, D2), lambda b: (b, 0, 0, 0)),
        scratch_shapes=[
            pltpu.VMEM((T1, W1, C), jnp.float32),       # h1, even width parity
            pltpu.VMEM((T1, W1, C), jnp.float32),       # h1, odd width parity
            pltpu.VMEM((T2, D2p, 9 * C), jnp.float32),  # fused im2col slab
            pltpu.VMEM((T2, D2p, C), jnp.float32),      # conv2 result staging
        ],
        compiler_params=pltpu.CompilerParams(
            dimension_semantics=("parallel",),
            vmem_limit_bytes=48 * 1024 * 1024,
        ),
    )(*xplanes, w1, b1, w2, b2)

    # Free metadata-only reshape: (B, T2, C, D2) -> (B, T2, C*D2).
    outputs = out4.reshape(B, T2, C * D2)
    output_lengths = (input_lengths >> 2) - 1
    return outputs, output_lengths


def _reference(inputs, input_lengths, params):
    x = inputs[:, None, :, :]
    y = jax.lax.conv_general_dilated(
        x, params["w1"], (2, 2), "VALID",
        dimension_numbers=("NCHW", "OIHW", "NCHW"))
    y = jax.nn.relu(y + params["b1"][None, :, None, None])
    y = jax.lax.conv_general_dilated(
        y, params["w2"], (2, 2), "VALID",
        dimension_numbers=("NCHW", "OIHW", "NCHW"))
    y = jax.nn.relu(y + params["b2"][None, :, None, None])
    B, C, T2, D2 = y.shape
    out = jnp.transpose(y, (0, 2, 1, 3)).reshape(B, T2, C * D2)
    return out, (input_lengths >> 2) - 1


if __name__ == "__main__":
    B, T, D, C = 2, 16, 16, 8      # batch, time, feature dim, out_channels
    key = jax.random.PRNGKey(0)
    k1, k2, k3, k4, k5 = jax.random.split(key, 5)
    params = {
        "w1": jax.random.normal(k1, (C, 1, 3, 3), jnp.float32) * 0.3,
        "b1": jax.random.normal(k2, (C,), jnp.float32) * 0.1,
        "w2": jax.random.normal(k3, (C, C, 3, 3), jnp.float32) * 0.2,
        "b2": jax.random.normal(k4, (C,), jnp.float32) * 0.1,
    }
    inputs = jax.random.normal(k5, (B, T, D), jnp.float32)
    input_lengths = jnp.array([16, 13], dtype=jnp.int32)

    outputs, output_lengths = jax.block_until_ready(
        conv2d_subsampling(inputs, input_lengths, params))

    ref_out, ref_len = _reference(inputs, input_lengths, params)
    assert outputs.shape == ref_out.shape, (outputs.shape, ref_out.shape)
    assert np.allclose(np.asarray(outputs), np.asarray(ref_out),
                       atol=1e-4, rtol=1e-4)
    assert np.array_equal(np.asarray(output_lengths), np.asarray(ref_len))
    print("KERNEL_OK")
</pallas_src>

<mosaic_0001>
module attributes {stable_mosaic.version = 11 : i64} {
  func.func @_subsample_kernel(%arg0: i32, %arg1: memref<1x8x5xf32, #tpu.memory_space<vmem>>, %arg2: memref<1x8x5xf32, #tpu.memory_space<vmem>>, %arg3: memref<1x8x5xf32, #tpu.memory_space<vmem>>, %arg4: memref<1x8x5xf32, #tpu.memory_space<vmem>>, %arg5: memref<1x8x5xf32, #tpu.memory_space<vmem>>, %arg6: memref<1x8x5xf32, #tpu.memory_space<vmem>>, %arg7: memref<1x8x5xf32, #tpu.memory_space<vmem>>, %arg8: memref<1x8x5xf32, #tpu.memory_space<vmem>>, %arg9: memref<9x8xf32, #tpu.memory_space<vmem>>, %arg10: memref<1x1x8xf32, #tpu.memory_space<vmem>>, %arg11: memref<72x8xf32, #tpu.memory_space<vmem>>, %arg12: memref<1x8xf32, #tpu.memory_space<vmem>>, %arg13: memref<1x3x8x3xf32, #tpu.memory_space<vmem>>, %arg14: memref<7x4x8xf32, #tpu.memory_space<vmem>>, %arg15: memref<7x4x8xf32, #tpu.memory_space<vmem>>, %arg16: memref<3x8x72xf32, #tpu.memory_space<vmem>>, %arg17: memref<3x8x8xf32, #tpu.memory_space<vmem>>) attributes {dimension_semantics = [#tpu.dimension_semantics<parallel>], iteration_bounds = array<i64: 2>, scalar_prefetch = 0 : i64, scratch_operands = 4 : i64, tpu.core_type = #tpu.core_type<tc>, window_params = [{transform_indices = @transform_0, window_bounds = array<i64: 1, 8, 5>}, {transform_indices = @transform_1, window_bounds = array<i64: 1, 8, 5>}, {transform_indices = @transform_2, window_bounds = array<i64: 1, 8, 5>}, {transform_indices = @transform_3, window_bounds = array<i64: 1, 8, 5>}, {transform_indices = @transform_4, window_bounds = array<i64: 1, 8, 5>}, {transform_indices = @transform_5, window_bounds = array<i64: 1, 8, 5>}, {transform_indices = @transform_6, window_bounds = array<i64: 1, 8, 5>}, {transform_indices = @transform_7, window_bounds = array<i64: 1, 8, 5>}, {pipeline_mode = #tpu.pipeline_mode<synchronous>, transform_indices = @transform_8, window_bounds = array<i64: 9, 8>}, {pipeline_mode = #tpu.pipeline_mode<synchronous>, transform_indices = @transform_9, window_bounds = array<i64: 1, 1, 8>}, {pipeline_mode = #tpu.pipeline_mode<synchronous>, transform_indices = @transform_10, window_bounds = array<i64: 72, 8>}, {pipeline_mode = #tpu.pipeline_mode<synchronous>, transform_indices = @transform_11, window_bounds = array<i64: 1, 8>}, {transform_indices = @transform_12, window_bounds = array<i64: 1, 3, 8, 3>}]} {
    %c0 = arith.constant 0 : index
    %c0_0 = arith.constant 0 : index
    %c0_1 = arith.constant 0 : index
    %0 = vector.load %arg1[%c0, %c0_0, %c0_1] : memref<1x8x5xf32, #tpu.memory_space<vmem>>, vector<1x7x4xf32>
    %1 = vector.shape_cast %0 : vector<1x7x4xf32> to vector<7x4xf32>
    %2 = vector.shape_cast %1 : vector<7x4xf32> to vector<7x4x1xf32>
    %c0_2 = arith.constant 0 : index
    %c0_3 = arith.constant 0 : index
    %3 = vector.load %arg9[%c0_2, %c0_3] : memref<9x8xf32, #tpu.memory_space<vmem>>, vector<1x8xf32>
    %4 = vector.shape_cast %3 : vector<1x8xf32> to vector<8xf32>
    %5 = vector.shape_cast %4 : vector<8xf32> to vector<1x1x8xf32>
    %6 = vector.broadcast %2 : vector<7x4x1xf32> to vector<7x4x8xf32>
    %7 = vector.broadcast %5 : vector<1x1x8xf32> to vector<7x4x8xf32>
    %8 = arith.mulf %6, %7 : vector<7x4x8xf32>
    %c0_4 = arith.constant 0 : index
    %c0_5 = arith.constant 0 : index
    %c0_6 = arith.constant 0 : index
    %9 = vector.load %arg10[%c0_4, %c0_5, %c0_6] : memref<1x1x8xf32, #tpu.memory_space<vmem>>, vector<1x1x8xf32>
    %10 = vector.broadcast %9 : vector<1x1x8xf32> to vector<7x4x8xf32>
    %11 = arith.addf %8, %10 : vector<7x4x8xf32>
    %c0_7 = arith.constant 0 : index
    %c0_8 = arith.constant 0 : index
    %c0_9 = arith.constant 0 : index
    %12 = vector.load %arg14[%c0_7, %c0_8, %c0_9] : memref<7x4x8xf32, #tpu.memory_space<vmem>>, vector<7x4x8xf32>
    tpu.vector_store %arg14[%c0_7, %c0_8, %c0_9], %11 {strides = array<i32>} : memref<7x4x8xf32, #tpu.memory_space<vmem>>, vector<7x4x8xf32>,
    %c0_10 = arith.constant 0 : index
    %c0_11 = arith.constant 0 : index
    %c0_12 = arith.constant 0 : index
    %13 = vector.load %arg2[%c0_10, %c0_11, %c0_12] : memref<1x8x5xf32, #tpu.memory_space<vmem>>, vector<1x7x4xf32>
    %14 = vector.shape_cast %13 : vector<1x7x4xf32> to vector<7x4xf32>
    %15 = vector.shape_cast %14 : vector<7x4xf32> to vector<7x4x1xf32>
    %c1 = arith.constant 1 : index
    %c0_13 = arith.constant 0 : index
    %16 = vector.load %arg9[%c1, %c0_13] : memref<9x8xf32, #tpu.memory_space<vmem>>, vector<1x8xf32>
    %17 = vector.shape_cast %16 : vector<1x8xf32> to vector<8xf32>
    %18 = vector.shape_cast %17 : vector<8xf32> to vector<1x1x8xf32>
    %19 = vector.broadcast %15 : vector<7x4x1xf32> to vector<7x4x8xf32>
    %20 = vector.broadcast %18 : vector<1x1x8xf32> to vector<7x4x8xf32>
    %21 = arith.mulf %19, %20 : vector<7x4x8xf32>
    %c0_14 = arith.constant 0 : index
    %c0_15 = arith.constant 0 : index
    %c0_16 = arith.constant 0 : index
    %22 = vector.load %arg14[%c0_14, %c0_15, %c0_16] : memref<7x4x8xf32, #tpu.memory_space<vmem>>, vector<7x4x8xf32>
    %23 = arith.addf %22, %21 : vector<7x4x8xf32>
    %c0_17 = arith.constant 0 : index
    %c0_18 = arith.constant 0 : index
    %c0_19 = arith.constant 0 : index
    %24 = vector.load %arg14[%c0_17, %c0_18, %c0_19] : memref<7x4x8xf32, #tpu.memory_space<vmem>>, vector<7x4x8xf32>
    tpu.vector_store %arg14[%c0_17, %c0_18, %c0_19], %23 {strides = array<i32>} : memref<7x4x8xf32, #tpu.memory_space<vmem>>, vector<7x4x8xf32>,
    %c0_20 = arith.constant 0 : index
    %c0_21 = arith.constant 0 : index
    %c0_22 = arith.constant 0 : index
    %25 = vector.load %arg3[%c0_20, %c0_21, %c0_22] : memref<1x8x5xf32, #tpu.memory_space<vmem>>, vector<1x7x4xf32>
    %26 = vector.shape_cast %25 : vector<1x7x4xf32> to vector<7x4xf32>
    %27 = vector.shape_cast %26 : vector<7x4xf32> to vector<7x4x1xf32>
    %c2 = arith.constant 2 : index
    %c0_23 = arith.constant 0 : index
    %28 = vector.load %arg9[%c2, %c0_23] : memref<9x8xf32, #tpu.memory_space<vmem>>, vector<1x8xf32>
    %29 = vector.shape_cast %28 : vector<1x8xf32> to vector<8xf32>
    %30 = vector.shape_cast %29 : vector<8xf32> to vector<1x1x8xf32>
    %31 = vector.broadcast %27 : vector<7x4x1xf32> to vector<7x4x8xf32>
    %32 = vector.broadcast %30 : vector<1x1x8xf32> to vector<7x4x8xf32>
    %33 = arith.mulf %31, %32 : vector<7x4x8xf32>
    %c0_24 = arith.constant 0 : index
    %c0_25 = arith.constant 0 : index
    %c0_26 = arith.constant 0 : index
    %34 = vector.load %arg14[%c0_24, %c0_25, %c0_26] : memref<7x4x8xf32, #tpu.memory_space<vmem>>, vector<7x4x8xf32>
    %35 = arith.addf %34, %33 : vector<7x4x8xf32>
    %c0_27 = arith.constant 0 : index
    %c0_28 = arith.constant 0 : index
    %c0_29 = arith.constant 0 : index
    %36 = vector.load %arg14[%c0_27, %c0_28, %c0_29] : memref<7x4x8xf32, #tpu.memory_space<vmem>>, vector<7x4x8xf32>
    tpu.vector_store %arg14[%c0_27, %c0_28, %c0_29], %35 {strides = array<i32>} : memref<7x4x8xf32, #tpu.memory_space<vmem>>, vector<7x4x8xf32>,
    %c0_30 = arith.constant 0 : index
    %c0_31 = arith.constant 0 : index
    %c0_32 = arith.constant 0 : index
    %37 = vector.load %arg5[%c0_30, %c0_31, %c0_32] : memref<1x8x5xf32, #tpu.memory_space<vmem>>, vector<1x7x4xf32>
    %38 = vector.shape_cast %37 : vector<1x7x4xf32> to vector<7x4xf32>
    %39 = vector.shape_cast %38 : vector<7x4xf32> to vector<7x4x1xf32>
    %c3 = arith.constant 3 : index
    %c0_33 = arith.constant 0 : index
    %40 = vector.load %arg9[%c3, %c0_33] : memref<9x8xf32, #tpu.memory_space<vmem>>, vector<1x8xf32>
    %41 = vector.shape_cast %40 : vector<1x8xf32> to vector<8xf32>
    %42 = vector.shape_cast %41 : vector<8xf32> to vector<1x1x8xf32>
    %43 = vector.broadcast %39 : vector<7x4x1xf32> to vector<7x4x8xf32>
    %44 = vector.broadcast %42 : vector<1x1x8xf32> to vector<7x4x8xf32>
    %45 = arith.mulf %43, %44 : vector<7x4x8xf32>
    %c0_34 = arith.constant 0 : index
    %c0_35 = arith.constant 0 : index
    %c0_36 = arith.constant 0 : index
    %46 = vector.load %arg14[%c0_34, %c0_35, %c0_36] : memref<7x4x8xf32, #tpu.memory_space<vmem>>, vector<7x4x8xf32>
    %47 = arith.addf %46, %45 : vector<7x4x8xf32>
    %c0_37 = arith.constant 0 : index
    %c0_38 = arith.constant 0 : index
    %c0_39 = arith.constant 0 : index
    %48 = vector.load %arg14[%c0_37, %c0_38, %c0_39] : memref<7x4x8xf32, #tpu.memory_space<vmem>>, vector<7x4x8xf32>
    tpu.vector_store %arg14[%c0_37, %c0_38, %c0_39], %47 {strides = array<i32>} : memref<7x4x8xf32, #tpu.memory_space<vmem>>, vector<7x4x8xf32>,
    %c0_40 = arith.constant 0 : index
    %c0_41 = arith.constant 0 : index
    %c0_42 = arith.constant 0 : index
    %49 = vector.load %arg6[%c0_40, %c0_41, %c0_42] : memref<1x8x5xf32, #tpu.memory_space<vmem>>, vector<1x7x4xf32>
    %50 = vector.shape_cast %49 : vector<1x7x4xf32> to vector<7x4xf32>
    %51 = vector.shape_cast %50 : vector<7x4xf32> to vector<7x4x1xf32>
    %c4 = arith.constant 4 : index
    %c0_43 = arith.constant 0 : index
    %52 = vector.load %arg9[%c4, %c0_43] : memref<9x8xf32, #tpu.memory_space<vmem>>, vector<1x8xf32>
    %53 = vector.shape_cast %52 : vector<1x8xf32> to vector<8xf32>
    %54 = vector.shape_cast %53 : vector<8xf32> to vector<1x1x8xf32>
    %55 = vector.broadcast %51 : vector<7x4x1xf32> to vector<7x4x8xf32>
    %56 = vector.broadcast %54 : vector<1x1x8xf32> to vector<7x4x8xf32>
    %57 = arith.mulf %55, %56 : vector<7x4x8xf32>
    %c0_44 = arith.constant 0 : index
    %c0_45 = arith.constant 0 : index
    %c0_46 = arith.constant 0 : index
    %58 = vector.load %arg14[%c0_44, %c0_45, %c0_46] : memref<7x4x8xf32, #tpu.memory_space<vmem>>, vector<7x4x8xf32>
    %59 = arith.addf %58, %57 : vector<7x4x8xf32>
    %c0_47 = arith.constant 0 : index
    %c0_48 = arith.constant 0 : index
    %c0_49 = arith.constant 0 : index
    %60 = vector.load %arg14[%c0_47, %c0_48, %c0_49] : memref<7x4x8xf32, #tpu.memory_space<vmem>>, vector<7x4x8xf32>
    tpu.vector_store %arg14[%c0_47, %c0_48, %c0_49], %59 {strides = array<i32>} : memref<7x4x8xf32, #tpu.memory_space<vmem>>, vector<7x4x8xf32>,
    %c0_50 = arith.constant 0 : index
    %c0_51 = arith.constant 0 : index
    %c0_52 = arith.constant 0 : index
    %61 = vector.load %arg7[%c0_50, %c0_51, %c0_52] : memref<1x8x5xf32, #tpu.memory_space<vmem>>, vector<1x7x4xf32>
    %62 = vector.shape_cast %61 : vector<1x7x4xf32> to vector<7x4xf32>
    %63 = vector.shape_cast %62 : vector<7x4xf32> to vector<7x4x1xf32>
    %c5 = arith.constant 5 : index
    %c0_53 = arith.constant 0 : index
    %64 = vector.load %arg9[%c5, %c0_53] : memref<9x8xf32, #tpu.memory_space<vmem>>, vector<1x8xf32>
    %65 = vector.shape_cast %64 : vector<1x8xf32> to vector<8xf32>
    %66 = vector.shape_cast %65 : vector<8xf32> to vector<1x1x8xf32>
    %67 = vector.broadcast %63 : vector<7x4x1xf32> to vector<7x4x8xf32>
    %68 = vector.broadcast %66 : vector<1x1x8xf32> to vector<7x4x8xf32>
    %69 = arith.mulf %67, %68 : vector<7x4x8xf32>
    %c0_54 = arith.constant 0 : index
    %c0_55 = arith.constant 0 : index
    %c0_56 = arith.constant 0 : index
    %70 = vector.load %arg14[%c0_54, %c0_55, %c0_56] : memref<7x4x8xf32, #tpu.memory_space<vmem>>, vector<7x4x8xf32>
    %71 = arith.addf %70, %69 : vector<7x4x8xf32>
    %c0_57 = arith.constant 0 : index
    %c0_58 = arith.constant 0 : index
    %c0_59 = arith.constant 0 : index
    %72 = vector.load %arg14[%c0_57, %c0_58, %c0_59] : memref<7x4x8xf32, #tpu.memory_space<vmem>>, vector<7x4x8xf32>
    tpu.vector_store %arg14[%c0_57, %c0_58, %c0_59], %71 {strides = array<i32>} : memref<7x4x8xf32, #tpu.memory_space<vmem>>, vector<7x4x8xf32>,
    %c0_60 = arith.constant 0 : index
    %c1_61 = arith.constant 1 : index
    %c0_62 = arith.constant 0 : index
    %73 = vector.load %arg1[%c0_60, %c1_61, %c0_62] : memref<1x8x5xf32, #tpu.memory_space<vmem>>, vector<1x7x4xf32>
    %74 = vector.shape_cast %73 : vector<1x7x4xf32> to vector<7x4xf32>
    %75 = vector.shape_cast %74 : vector<7x4xf32> to vector<7x4x1xf32>
    %c6 = arith.constant 6 : index
    %c0_63 = arith.constant 0 : index
    %76 = vector.load %arg9[%c6, %c0_63] : memref<9x8xf32, #tpu.memory_space<vmem>>, vector<1x8xf32>
    %77 = vector.shape_cast %76 : vector<1x8xf32> to vector<8xf32>
    %78 = vector.shape_cast %77 : vector<8xf32> to vector<1x1x8xf32>
    %79 = vector.broadcast %75 : vector<7x4x1xf32> to vector<7x4x8xf32>
    %80 = vector.broadcast %78 : vector<1x1x8xf32> to vector<7x4x8xf32>
    %81 = arith.mulf %79, %80 : vector<7x4x8xf32>
    %c0_64 = arith.constant 0 : index
    %c0_65 = arith.constant 0 : index
    %c0_66 = arith.constant 0 : index
    %82 = vector.load %arg14[%c0_64, %c0_65, %c0_66] : memref<7x4x8xf32, #tpu.memory_space<vmem>>, vector<7x4x8xf32>
    %83 = arith.addf %82, %81 : vector<7x4x8xf32>
    %c0_67 = arith.constant 0 : index
    %c0_68 = arith.constant 0 : index
    %c0_69 = arith.constant 0 : index
    %84 = vector.load %arg14[%c0_67, %c0_68, %c0_69] : memref<7x4x8xf32, #tpu.memory_space<vmem>>, vector<7x4x8xf32>
    tpu.vector_store %arg14[%c0_67, %c0_68, %c0_69], %83 {strides = array<i32>} : memref<7x4x8xf32, #tpu.memory_space<vmem>>, vector<7x4x8xf32>,
    %c0_70 = arith.constant 0 : index
    %c1_71 = arith.constant 1 : index
    %c0_72 = arith.constant 0 : index
    %85 = vector.load %arg2[%c0_70, %c1_71, %c0_72] : memref<1x8x5xf32, #tpu.memory_space<vmem>>, vector<1x7x4xf32>
    %86 = vector.shape_cast %85 : vector<1x7x4xf32> to vector<7x4xf32>
    %87 = vector.shape_cast %86 : vector<7x4xf32> to vector<7x4x1xf32>
    %c7 = arith.constant 7 : index
    %c0_73 = arith.constant 0 : index
    %88 = vector.load %arg9[%c7, %c0_73] : memref<9x8xf32, #tpu.memory_space<vmem>>, vector<1x8xf32>
    %89 = vector.shape_cast %88 : vector<1x8xf32> to vector<8xf32>
    %90 = vector.shape_cast %89 : vector<8xf32> to vector<1x1x8xf32>
    %91 = vector.broadcast %87 : vector<7x4x1xf32> to vector<7x4x8xf32>
    %92 = vector.broadcast %90 : vector<1x1x8xf32> to vector<7x4x8xf32>
    %93 = arith.mulf %91, %92 : vector<7x4x8xf32>
    %c0_74 = arith.constant 0 : index
    %c0_75 = arith.constant 0 : index
    %c0_76 = arith.constant 0 : index
    %94 = vector.load %arg14[%c0_74, %c0_75, %c0_76] : memref<7x4x8xf32, #tpu.memory_space<vmem>>, vector<7x4x8xf32>
    %95 = arith.addf %94, %93 : vector<7x4x8xf32>
    %c0_77 = arith.constant 0 : index
    %c0_78 = arith.constant 0 : index
    %c0_79 = arith.constant 0 : index
    %96 = vector.load %arg14[%c0_77, %c0_78, %c0_79] : memref<7x4x8xf32, #tpu.memory_space<vmem>>, vector<7x4x8xf32>
    tpu.vector_store %arg14[%c0_77, %c0_78, %c0_79], %95 {strides = array<i32>} : memref<7x4x8xf32, #tpu.memory_space<vmem>>, vector<7x4x8xf32>,
    %c0_80 = arith.constant 0 : index
    %c1_81 = arith.constant 1 : index
    %c0_82 = arith.constant 0 : index
    %97 = vector.load %arg3[%c0_80, %c1_81, %c0_82] : memref<1x8x5xf32, #tpu.memory_space<vmem>>, vector<1x7x4xf32>
    %98 = vector.shape_cast %97 : vector<1x7x4xf32> to vector<7x4xf32>
    %99 = vector.shape_cast %98 : vector<7x4xf32> to vector<7x4x1xf32>
    %c8 = arith.constant 8 : index
    %c0_83 = arith.constant 0 : index
    %100 = vector.load %arg9[%c8, %c0_83] : memref<9x8xf32, #tpu.memory_space<vmem>>, vector<1x8xf32>
    %101 = vector.shape_cast %100 : vector<1x8xf32> to vector<8xf32>
    %102 = vector.shape_cast %101 : vector<8xf32> to vector<1x1x8xf32>
    %103 = vector.broadcast %99 : vector<7x4x1xf32> to vector<7x4x8xf32>
    %104 = vector.broadcast %102 : vector<1x1x8xf32> to vector<7x4x8xf32>
    %105 = arith.mulf %103, %104 : vector<7x4x8xf32>
    %c0_84 = arith.constant 0 : index
    %c0_85 = arith.constant 0 : index
    %c0_86 = arith.constant 0 : index
    %106 = vector.load %arg14[%c0_84, %c0_85, %c0_86] : memref<7x4x8xf32, #tpu.memory_space<vmem>>, vector<7x4x8xf32>
    %107 = arith.addf %106, %105 : vector<7x4x8xf32>
    %cst = arith.constant 0.000000e+00 : f32
    %108 = vector.broadcast %cst : f32 to vector<7x4x8xf32>
    %109 = arith.maximumf %107, %108 : vector<7x4x8xf32>
    %c0_87 = arith.constant 0 : index
    %c0_88 = arith.constant 0 : index
    %c0_89 = arith.constant 0 : index
    %110 = vector.load %arg14[%c0_87, %c0_88, %c0_89] : memref<7x4x8xf32, #tpu.memory_space<vmem>>, vector<7x4x8xf32>
    tpu.vector_store %arg14[%c0_87, %c0_88, %c0_89], %109 {strides = array<i32>} : memref<7x4x8xf32, #tpu.memory_space<vmem>>, vector<7x4x8xf32>,
    %c0_90 = arith.constant 0 : index
    %c0_91 = arith.constant 0 : index
    %c0_92 = arith.constant 0 : index
    %111 = vector.load %arg3[%c0_90, %c0_91, %c0_92] : memref<1x8x5xf32, #tpu.memory_space<vmem>>, vector<1x7x4xf32>
    %112 = vector.shape_cast %111 : vector<1x7x4xf32> to vector<7x4xf32>
    %113 = vector.shape_cast %112 : vector<7x4xf32> to vector<7x4x1xf32>
    %c0_93 = arith.constant 0 : index
    %c0_94 = arith.constant 0 : index
    %114 = vector.load %arg9[%c0_93, %c0_94] : memref<9x8xf32, #tpu.memory_space<vmem>>, vector<1x8xf32>
    %115 = vector.shape_cast %114 : vector<1x8xf32> to vector<8xf32>
    %116 = vector.shape_cast %115 : vector<8xf32> to vector<1x1x8xf32>
    %117 = vector.broadcast %113 : vector<7x4x1xf32> to vector<7x4x8xf32>
    %118 = vector.broadcast %116 : vector<1x1x8xf32> to vector<7x4x8xf32>
    %119 = arith.mulf %117, %118 : vector<7x4x8xf32>
    %c0_95 = arith.constant 0 : index
    %c0_96 = arith.constant 0 : index
    %c0_97 = arith.constant 0 : index
    %120 = vector.load %arg10[%c0_95, %c0_96, %c0_97] : memref<1x1x8xf32, #tpu.memory_space<vmem>>, vector<1x1x8xf32>
    %121 = vector.broadcast %120 : vector<1x1x8xf32> to vector<7x4x8xf32>
    %122 = arith.addf %119, %121 : vector<7x4x8xf32>
    %c0_98 = arith.constant 0 : index
    %c0_99 = arith.constant 0 : index
    %c0_100 = arith.constant 0 : index
    %123 = vector.load %arg15[%c0_98, %c0_99, %c0_100] : memref<7x4x8xf32, #tpu.memory_space<vmem>>, vector<7x4x8xf32>
    tpu.vector_store %arg15[%c0_98, %c0_99, %c0_100], %122 {strides = array<i32>} : memref<7x4x8xf32, #tpu.memory_space<vmem>>, vector<7x4x8xf32>,
    %c0_101 = arith.constant 0 : index
    %c0_102 = arith.constant 0 : index
    %c0_103 = arith.constant 0 : index
    %124 = vector.load %arg4[%c0_101, %c0_102, %c0_103] : memref<1x8x5xf32, #tpu.memory_space<vmem>>, vector<1x7x4xf32>
    %125 = vector.shape_cast %124 : vector<1x7x4xf32> to vector<7x4xf32>
    %126 = vector.shape_cast %125 : vector<7x4xf32> to vector<7x4x1xf32>
    %c1_104 = arith.constant 1 : index
    %c0_105 = arith.constant 0 : index
    %127 = vector.load %arg9[%c1_104, %c0_105] : memref<9x8xf32, #tpu.memory_space<vmem>>, vector<1x8xf32>
    %128 = vector.shape_cast %127 : vector<1x8xf32> to vector<8xf32>
    %129 = vector.shape_cast %128 : vector<8xf32> to vector<1x1x8xf32>
    %130 = vector.broadcast %126 : vector<7x4x1xf32> to vector<7x4x8xf32>
    %131 = vector.broadcast %129 : vector<1x1x8xf32> to vector<7x4x8xf32>
    %132 = arith.mulf %130, %131 : vector<7x4x8xf32>
    %c0_106 = arith.constant 0 : index
    %c0_107 = arith.constant 0 : index
    %c0_108 = arith.constant 0 : index
    %133 = vector.load %arg15[%c0_106, %c0_107, %c0_108] : memref<7x4x8xf32, #tpu.memory_space<vmem>>, vector<7x4x8xf32>
    %134 = arith.addf %133, %132 : vector<7x4x8xf32>
    %c0_109 = arith.constant 0 : index
    %c0_110 = arith.constant 0 : index
    %c0_111 = arith.constant 0 : index
    %135 = vector.load %arg15[%c0_109, %c0_110, %c0_111] : memref<7x4x8xf32, #tpu.memory_space<vmem>>, vector<7x4x8xf32>
    tpu.vector_store %arg15[%c0_109, %c0_110, %c0_111], %134 {strides = array<i32>} : memref<7x4x8xf32, #tpu.memory_space<vmem>>, vector<7x4x8xf32>,
    %c0_112 = arith.constant 0 : index
    %c0_113 = arith.constant 0 : index
    %c1_114 = arith.constant 1 : index
    %136 = vector.load %arg1[%c0_112, %c0_113, %c1_114] : memref<1x8x5xf32, #tpu.memory_space<vmem>>, vector<1x7x4xf32>
    %137 = vector.shape_cast %136 : vector<1x7x4xf32> to vector<7x4xf32>
    %138 = vector.shape_cast %137 : vector<7x4xf32> to vector<7x4x1xf32>
    %c2_115 = arith.constant 2 : index
    %c0_116 = arith.constant 0 : index
    %139 = vector.load %arg9[%c2_115, %c0_116] : memref<9x8xf32, #tpu.memory_space<vmem>>, vector<1x8xf32>
    %140 = vector.shape_cast %139 : vector<1x8xf32> to vector<8xf32>
    %141 = vector.shape_cast %140 : vector<8xf32> to vector<1x1x8xf32>
    %142 = vector.broadcast %138 : vector<7x4x1xf32> to vector<7x4x8xf32>
    %143 = vector.broadcast %141 : vector<1x1x8xf32> to vector<7x4x8xf32>
    %144 = arith.mulf %142, %143 : vector<7x4x8xf32>
    %c0_117 = arith.constant 0 : index
    %c0_118 = arith.constant 0 : index
    %c0_119 = arith.constant 0 : index
    %145 = vector.load %arg15[%c0_117, %c0_118, %c0_119] : memref<7x4x8xf32, #tpu.memory_space<vmem>>, vector<7x4x8xf32>
    %146 = arith.addf %145, %144 : vector<7x4x8xf32>
    %c0_120 = arith.constant 0 : index
    %c0_121 = arith.constant 0 : index
    %c0_122 = arith.constant 0 : index
    %147 = vector.load %arg15[%c0_120, %c0_121, %c0_122] : memref<7x4x8xf32, #tpu.memory_space<vmem>>, vector<7x4x8xf32>
    tpu.vector_store %arg15[%c0_120, %c0_121, %c0_122], %146 {strides = array<i32>} : memref<7x4x8xf32, #tpu.memory_space<vmem>>, vector<7x4x8xf32>,
    %c0_123 = arith.constant 0 : index
    %c0_124 = arith.constant 0 : index
    %c0_125 = arith.constant 0 : index
    %148 = vector.load %arg7[%c0_123, %c0_124, %c0_125] : memref<1x8x5xf32, #tpu.memory_space<vmem>>, vector<1x7x4xf32>
    %149 = vector.shape_cast %148 : vector<1x7x4xf32> to vector<7x4xf32>
    %150 = vector.shape_cast %149 : vector<7x4xf32> to vector<7x4x1xf32>
    %c3_126 = arith.constant 3 : index
    %c0_127 = arith.constant 0 : index
    %151 = vector.load %arg9[%c3_126, %c0_127] : memref<9x8xf32, #tpu.memory_space<vmem>>, vector<1x8xf32>
    %152 = vector.shape_cast %151 : vector<1x8xf32> to vector<8xf32>
    %153 = vector.shape_cast %152 : vector<8xf32> to vector<1x1x8xf32>
    %154 = vector.broadcast %150 : vector<7x4x1xf32> to vector<7x4x8xf32>
    %155 = vector.broadcast %153 : vector<1x1x8xf32> to vector<7x4x8xf32>
    %156 = arith.mulf %154, %155 : vector<7x4x8xf32>
    %c0_128 = arith.constant 0 : index
    %c0_129 = arith.constant 0 : index
    %c0_130 = arith.constant 0 : index
    %157 = vector.load %arg15[%c0_128, %c0_129, %c0_130] : memref<7x4x8xf32, #tpu.memory_space<vmem>>, vector<7x4x8xf32>
    %158 = arith.addf %157, %156 : vector<7x4x8xf32>
    %c0_131 = arith.constant 0 : index
    %c0_132 = arith.constant 0 : index
    %c0_133 = arith.constant 0 : index
    %159 = vector.load %arg15[%c0_131, %c0_132, %c0_133] : memref<7x4x8xf32, #tpu.memory_space<vmem>>, vector<7x4x8xf32>
    tpu.vector_store %arg15[%c0_131, %c0_132, %c0_133], %158 {strides = array<i32>} : memref<7x4x8xf32, #tpu.memory_space<vmem>>, vector<7x4x8xf32>,
    %c0_134 = arith.constant 0 : index
    %c0_135 = arith.constant 0 : index
    %c0_136 = arith.constant 0 : index
    %160 = vector.load %arg8[%c0_134, %c0_135, %c0_136] : memref<1x8x5xf32, #tpu.memory_space<vmem>>, vector<1x7x4xf32>
    %161 = vector.shape_cast %160 : vector<1x7x4xf32> to vector<7x4xf32>
    %162 = vector.shape_cast %161 : vector<7x4xf32> to vector<7x4x1xf32>
    %c4_137 = arith.constant 4 : index
    %c0_138 = arith.constant 0 : index
    %163 = vector.load %arg9[%c4_137, %c0_138] : memref<9x8xf32, #tpu.memory_space<vmem>>, vector<1x8xf32>
    %164 = vector.shape_cast %163 : vector<1x8xf32> to vector<8xf32>
    %165 = vector.shape_cast %164 : vector<8xf32> to vector<1x1x8xf32>
    %166 = vector.broadcast %162 : vector<7x4x1xf32> to vector<7x4x8xf32>
    %167 = vector.broadcast %165 : vector<1x1x8xf32> to vector<7x4x8xf32>
    %168 = arith.mulf %166, %167 : vector<7x4x8xf32>
    %c0_139 = arith.constant 0 : index
    %c0_140 = arith.constant 0 : index
    %c0_141 = arith.constant 0 : index
    %169 = vector.load %arg15[%c0_139, %c0_140, %c0_141] : memref<7x4x8xf32, #tpu.memory_space<vmem>>, vector<7x4x8xf32>
    %170 = arith.addf %169, %168 : vector<7x4x8xf32>
    %c0_142 = arith.constant 0 : index
    %c0_143 = arith.constant 0 : index
    %c0_144 = arith.constant 0 : index
    %171 = vector.load %arg15[%c0_142, %c0_143, %c0_144] : memref<7x4x8xf32, #tpu.memory_space<vmem>>, vector<7x4x8xf32>
    tpu.vector_store %arg15[%c0_142, %c0_143, %c0_144], %170 {strides = array<i32>} : memref<7x4x8xf32, #tpu.memory_space<vmem>>, vector<7x4x8xf32>,
    %c0_145 = arith.constant 0 : index
    %c0_146 = arith.constant 0 : index
    %c1_147 = arith.constant 1 : index
    %172 = vector.load %arg5[%c0_145, %c0_146, %c1_147] : memref<1x8x5xf32, #tpu.memory_space<vmem>>, vector<1x7x4xf32>
    %173 = vector.shape_cast %172 : vector<1x7x4xf32> to vector<7x4xf32>
    %174 = vector.shape_cast %173 : vector<7x4xf32> to vector<7x4x1xf32>
    %c5_148 = arith.constant 5 : index
    %c0_149 = arith.constant 0 : index
    %175 = vector.load %arg9[%c5_148, %c0_149] : memref<9x8xf32, #tpu.memory_space<vmem>>, vector<1x8xf32>
    %176 = vector.shape_cast %175 : vector<1x8xf32> to vector<8xf32>
    %177 = vector.shape_cast %176 : vector<8xf32> to vector<1x1x8xf32>
    %178 = vector.broadcast %174 : vector<7x4x1xf32> to vector<7x4x8xf32>
    %179 = vector.broadcast %177 : vector<1x1x8xf32> to vector<7x4x8xf32>
    %180 = arith.mulf %178, %179 : vector<7x4x8xf32>
    %c0_150 = arith.constant 0 : index
    %c0_151 = arith.constant 0 : index
    %c0_152 = arith.constant 0 : index
    %181 = vector.load %arg15[%c0_150, %c0_151, %c0_152] : memref<7x4x8xf32, #tpu.memory_space<vmem>>, vector<7x4x8xf32>
    %182 = arith.addf %181, %180 : vector<7x4x8xf32>
    %c0_153 = arith.constant 0 : index
    %c0_154 = arith.constant 0 : index
    %c0_155 = arith.constant 0 : index
    %183 = vector.load %arg15[%c0_153, %c0_154, %c0_155] : memref<7x4x8xf32, #tpu.memory_space<vmem>>, vector<7x4x8xf32>
    tpu.vector_store %arg15[%c0_153, %c0_154, %c0_155], %182 {strides = array<i32>} : memref<7x4x8xf32, #tpu.memory_space<vmem>>, vector<7x4x8xf32>,
    %c0_156 = arith.constant 0 : index
    %c1_157 = arith.constant 1 : index
    %c0_158 = arith.constant 0 : index
    %184 = vector.load %arg3[%c0_156, %c1_157, %c0_158] : memref<1x8x5xf32, #tpu.memory_space<vmem>>, vector<1x7x4xf32>
    %185 = vector.shape_cast %184 : vector<1x7x4xf32> to vector<7x4xf32>
    %186 = vector.shape_cast %185 : vector<7x4xf32> to vector<7x4x1xf32>
    %c6_159 = arith.constant 6 : index
    %c0_160 = arith.constant 0 : index
    %187 = vector.load %arg9[%c6_159, %c0_160] : memref<9x8xf32, #tpu.memory_space<vmem>>, vector<1x8xf32>
    %188 = vector.shape_cast %187 : vector<1x8xf32> to vector<8xf32>
    %189 = vector.shape_cast %188 : vector<8xf32> to vector<1x1x8xf32>
    %190 = vector.broadcast %186 : vector<7x4x1xf32> to vector<7x4x8xf32>
    %191 = vector.broadcast %189 : vector<1x1x8xf32> to vector<7x4x8xf32>
    %192 = arith.mulf %190, %191 : vector<7x4x8xf32>
    %c0_161 = arith.constant 0 : index
    %c0_162 = arith.constant 0 : index
    %c0_163 = arith.constant 0 : index
    %193 = vector.load %arg15[%c0_161, %c0_162, %c0_163] : memref<7x4x8xf32, #tpu.memory_space<vmem>>, vector<7x4x8xf32>
    %194 = arith.addf %193, %192 : vector<7x4x8xf32>
    %c0_164 = arith.constant 0 : index
    %c0_165 = arith.constant 0 : index
    %c0_166 = arith.constant 0 : index
    %195 = vector.load %arg15[%c0_164, %c0_165, %c0_166] : memref<7x4x8xf32, #tpu.memory_space<vmem>>, vector<7x4x8xf32>
    tpu.vector_store %arg15[%c0_164, %c0_165, %c0_166], %194 {strides = array<i32>} : memref<7x4x8xf32, #tpu.memory_space<vmem>>, vector<7x4x8xf32>,
    %c0_167 = arith.constant 0 : index
    %c1_168 = arith.constant 1 : index
    %c0_169 = arith.constant 0 : index
    %196 = vector.load %arg4[%c0_167, %c1_168, %c0_169] : memref<1x8x5xf32, #tpu.memory_space<vmem>>, vector<1x7x4xf32>
    %197 = vector.shape_cast %196 : vector<1x7x4xf32> to vector<7x4xf32>
    %198 = vector.shape_cast %197 : vector<7x4xf32> to vector<7x4x1xf32>
    %c7_170 = arith.constant 7 : index
    %c0_171 = arith.constant 0 : index
    %199 = vector.load %arg9[%c7_170, %c0_171] : memref<9x8xf32, #tpu.memory_space<vmem>>, vector<1x8xf32>
    %200 = vector.shape_cast %199 : vector<1x8xf32> to vector<8xf32>
    %201 = vector.shape_cast %200 : vector<8xf32> to vector<1x1x8xf32>
    %202 = vector.broadcast %198 : vector<7x4x1xf32> to vector<7x4x8xf32>
    %203 = vector.broadcast %201 : vector<1x1x8xf32> to vector<7x4x8xf32>
    %204 = arith.mulf %202, %203 : vector<7x4x8xf32>
    %c0_172 = arith.constant 0 : index
    %c0_173 = arith.constant 0 : index
    %c0_174 = arith.constant 0 : index
    %205 = vector.load %arg15[%c0_172, %c0_173, %c0_174] : memref<7x4x8xf32, #tpu.memory_space<vmem>>, vector<7x4x8xf32>
    %206 = arith.addf %205, %204 : vector<7x4x8xf32>
    %c0_175 = arith.constant 0 : index
    %c0_176 = arith.constant 0 : index
    %c0_177 = arith.constant 0 : index
    %207 = vector.load %arg15[%c0_175, %c0_176, %c0_177] : memref<7x4x8xf32, #tpu.memory_space<vmem>>, vector<7x4x8xf32>
    tpu.vector_store %arg15[%c0_175, %c0_176, %c0_177], %206 {strides = array<i32>} : memref<7x4x8xf32, #tpu.memory_space<vmem>>, vector<7x4x8xf32>,
    %c0_178 = arith.constant 0 : index
    %c1_179 = arith.constant 1 : index
    %c1_180 = arith.constant 1 : index
    %208 = vector.load %arg1[%c0_178, %c1_179, %c1_180] : memref<1x8x5xf32, #tpu.memory_space<vmem>>, vector<1x7x4xf32>
    %209 = vector.shape_cast %208 : vector<1x7x4xf32> to vector<7x4xf32>
    %210 = vector.shape_cast %209 : vector<7x4xf32> to vector<7x4x1xf32>
    %c8_181 = arith.constant 8 : index
    %c0_182 = arith.constant 0 : index
    %211 = vector.load %arg9[%c8_181, %c0_182] : memref<9x8xf32, #tpu.memory_space<vmem>>, vector<1x8xf32>
    %212 = vector.shape_cast %211 : vector<1x8xf32> to vector<8xf32>
    %213 = vector.shape_cast %212 : vector<8xf32> to vector<1x1x8xf32>
    %214 = vector.broadcast %210 : vector<7x4x1xf32> to vector<7x4x8xf32>
    %215 = vector.broadcast %213 : vector<1x1x8xf32> to vector<7x4x8xf32>
    %216 = arith.mulf %214, %215 : vector<7x4x8xf32>
    %c0_183 = arith.constant 0 : index
    %c0_184 = arith.constant 0 : index
    %c0_185 = arith.constant 0 : index
    %217 = vector.load %arg15[%c0_183, %c0_184, %c0_185] : memref<7x4x8xf32, #tpu.memory_space<vmem>>, vector<7x4x8xf32>
    %218 = arith.addf %217, %216 : vector<7x4x8xf32>
    %cst_186 = arith.constant 0.000000e+00 : f32
    %219 = vector.broadcast %cst_186 : f32 to vector<7x4x8xf32>
    %220 = arith.maximumf %218, %219 : vector<7x4x8xf32>
    %c0_187 = arith.constant 0 : index
    %c0_188 = arith.constant 0 : index
    %c0_189 = arith.constant 0 : index
    %221 = vector.load %arg15[%c0_187, %c0_188, %c0_189] : memref<7x4x8xf32, #tpu.memory_space<vmem>>, vector<7x4x8xf32>
    tpu.vector_store %arg15[%c0_187, %c0_188, %c0_189], %220 {strides = array<i32>} : memref<7x4x8xf32, #tpu.memory_space<vmem>>, vector<7x4x8xf32>,
    %c0_190 = arith.constant 0 : index
    %c0_191 = arith.constant 0 : index
    %c0_192 = arith.constant 0 : index
    %222 = tpu.strided_load %arg14[%c0_190, %c0_191, %c0_192] {strides = array<i32: 2, 1, 1>} : memref<7x4x8xf32, #tpu.memory_space<vmem>>, vector<3x3x8xf32>
    %c0_193 = arith.constant 0 : index
    %c0_194 = arith.constant 0 : index
    %c0_195 = arith.constant 0 : index
    %223 = vector.load %arg16[%c0_193, %c0_194, %c0_195] : memref<3x8x72xf32, #tpu.memory_space<vmem>>, vector<3x3x8xf32>
    tpu.vector_store %arg16[%c0_193, %c0_194, %c0_195], %222 {strides = array<i32>} : memref<3x8x72xf32, #tpu.memory_space<vmem>>, vector<3x3x8xf32>,
    %c0_196 = arith.constant 0 : index
    %c0_197 = arith.constant 0 : index
    %c0_198 = arith.constant 0 : index
    %224 = tpu.strided_load %arg15[%c0_196, %c0_197, %c0_198] {strides = array<i32: 2, 1, 1>} : memref<7x4x8xf32, #tpu.memory_space<vmem>>, vector<3x3x8xf32>
    %c0_199 = arith.constant 0 : index
    %c0_200 = arith.constant 0 : index
    %c8_201 = arith.constant 8 : index
    %225 = vector.load %arg16[%c0_199, %c0_200, %c8_201] : memref<3x8x72xf32, #tpu.memory_space<vmem>>, vector<3x3x8xf32>
    tpu.vector_store %arg16[%c0_199, %c0_200, %c8_201], %224 {strides = array<i32>} : memref<3x8x72xf32, #tpu.memory_space<vmem>>, vector<3x3x8xf32>,
    %c0_202 = arith.constant 0 : index
    %c1_203 = arith.constant 1 : index
    %c0_204 = arith.constant 0 : index
    %226 = tpu.strided_load %arg14[%c0_202, %c1_203, %c0_204] {strides = array<i32: 2, 1, 1>} : memref<7x4x8xf32, #tpu.memory_space<vmem>>, vector<3x3x8xf32>
    %c0_205 = arith.constant 0 : index
    %c0_206 = arith.constant 0 : index
    %c16 = arith.constant 16 : index
    %227 = vector.load %arg16[%c0_205, %c0_206, %c16] : memref<3x8x72xf32, #tpu.memory_space<vmem>>, vector<3x3x8xf32>
    tpu.vector_store %arg16[%c0_205, %c0_206, %c16], %226 {strides = array<i32>} : memref<3x8x72xf32, #tpu.memory_space<vmem>>, vector<3x3x8xf32>,
    %c1_207 = arith.constant 1 : index
    %c0_208 = arith.constant 0 : index
    %c0_209 = arith.constant 0 : index
    %228 = tpu.strided_load %arg14[%c1_207, %c0_208, %c0_209] {strides = array<i32: 2, 1, 1>} : memref<7x4x8xf32, #tpu.memory_space<vmem>>, vector<3x3x8xf32>
    %c0_210 = arith.constant 0 : index
    %c0_211 = arith.constant 0 : index
    %c24 = arith.constant 24 : index
    %229 = vector.load %arg16[%c0_210, %c0_211, %c24] : memref<3x8x72xf32, #tpu.memory_space<vmem>>, vector<3x3x8xf32>
    tpu.vector_store %arg16[%c0_210, %c0_211, %c24], %228 {strides = array<i32>} : memref<3x8x72xf32, #tpu.memory_space<vmem>>, vector<3x3x8xf32>,
    %c1_212 = arith.constant 1 : index
    %c0_213 = arith.constant 0 : index
    %c0_214 = arith.constant 0 : index
    %230 = tpu.strided_load %arg15[%c1_212, %c0_213, %c0_214] {strides = array<i32: 2, 1, 1>} : memref<7x4x8xf32, #tpu.memory_space<vmem>>, vector<3x3x8xf32>
    %c0_215 = arith.constant 0 : index
    %c0_216 = arith.constant 0 : index
    %c32 = arith.constant 32 : index
    %231 = vector.load %arg16[%c0_215, %c0_216, %c32] : memref<3x8x72xf32, #tpu.memory_space<vmem>>, vector<3x3x8xf32>
    tpu.vector_store %arg16[%c0_215, %c0_216, %c32], %230 {strides = array<i32>} : memref<3x8x72xf32, #tpu.memory_space<vmem>>, vector<3x3x8xf32>,
    %c1_217 = arith.constant 1 : index
    %c1_218 = arith.constant 1 : index
    %c0_219 = arith.constant 0 : index
    %232 = tpu.strided_load %arg14[%c1_217, %c1_218, %c0_219] {strides = array<i32: 2, 1, 1>} : memref<7x4x8xf32, #tpu.memory_space<vmem>>, vector<3x3x8xf32>
    %c0_220 = arith.constant 0 : index
    %c0_221 = arith.constant 0 : index
    %c40 = arith.constant 40 : index
    %233 = vector.load %arg16[%c0_220, %c0_221, %c40] : memref<3x8x72xf32, #tpu.memory_space<vmem>>, vector<3x3x8xf32>
    tpu.vector_store %arg16[%c0_220, %c0_221, %c40], %232 {strides = array<i32>} : memref<3x8x72xf32, #tpu.memory_space<vmem>>, vector<3x3x8xf32>,
    %c2_222 = arith.constant 2 : index
    %c0_223 = arith.constant 0 : index
    %c0_224 = arith.constant 0 : index
    %234 = tpu.strided_load %arg14[%c2_222, %c0_223, %c0_224] {strides = array<i32: 2, 1, 1>} : memref<7x4x8xf32, #tpu.memory_space<vmem>>, vector<3x3x8xf32>
    %c0_225 = arith.constant 0 : index
    %c0_226 = arith.constant 0 : index
    %c48 = arith.constant 48 : index
    %235 = vector.load %arg16[%c0_225, %c0_226, %c48] : memref<3x8x72xf32, #tpu.memory_space<vmem>>, vector<3x3x8xf32>
    tpu.vector_store %arg16[%c0_225, %c0_226, %c48], %234 {strides = array<i32>} : memref<3x8x72xf32, #tpu.memory_space<vmem>>, vector<3x3x8xf32>,
    %c2_227 = arith.constant 2 : index
    %c0_228 = arith.constant 0 : index
    %c0_229 = arith.constant 0 : index
    %236 = tpu.strided_load %arg15[%c2_227, %c0_228, %c0_229] {strides = array<i32: 2, 1, 1>} : memref<7x4x8xf32, #tpu.memory_space<vmem>>, vector<3x3x8xf32>
    %c0_230 = arith.constant 0 : index
    %c0_231 = arith.constant 0 : index
    %c56 = arith.constant 56 : index
    %237 = vector.load %arg16[%c0_230, %c0_231, %c56] : memref<3x8x72xf32, #tpu.memory_space<vmem>>, vector<3x3x8xf32>
    tpu.vector_store %arg16[%c0_230, %c0_231, %c56], %236 {strides = array<i32>} : memref<3x8x72xf32, #tpu.memory_space<vmem>>, vector<3x3x8xf32>,
    %c2_232 = arith.constant 2 : index
    %c1_233 = arith.constant 1 : index
    %c0_234 = arith.constant 0 : index
    %238 = tpu.strided_load %arg14[%c2_232, %c1_233, %c0_234] {strides = array<i32: 2, 1, 1>} : memref<7x4x8xf32, #tpu.memory_space<vmem>>, vector<3x3x8xf32>
    %c0_235 = arith.constant 0 : index
    %c0_236 = arith.constant 0 : index
    %c64 = arith.constant 64 : index
    %239 = vector.load %arg16[%c0_235, %c0_236, %c64] : memref<3x8x72xf32, #tpu.memory_space<vmem>>, vector<3x3x8xf32>
    tpu.vector_store %arg16[%c0_235, %c0_236, %c64], %238 {strides = array<i32>} : memref<3x8x72xf32, #tpu.memory_space<vmem>>, vector<3x3x8xf32>,
    %c0_237 = arith.constant 0 : index
    %c0_238 = arith.constant 0 : index
    %c0_239 = arith.constant 0 : index
    %240 = vector.load %arg16[%c0_237, %c0_238, %c0_239] : memref<3x8x72xf32, #tpu.memory_space<vmem>>, vector<3x8x72xf32>
    %241 = vector.shape_cast %240 : vector<3x8x72xf32> to vector<24x72xf32>
    %c0_240 = arith.constant 0 : index
    %c0_241 = arith.constant 0 : index
    %242 = vector.load %arg11[%c0_240, %c0_241] : memref<72x8xf32, #tpu.memory_space<vmem>>, vector<72x8xf32>
    %cst_242 = arith.constant dense<0.000000e+00> : vector<24x8xf32>
    %243 = tpu.matmul %241, %242, %cst_242 {dimension_numbers = #tpu.dot_dimension_numbers<[1], [0], [0], [1], [0, 0, 1, 1], [], []>} : vector<24x72xf32>, vector<72x8xf32>, vector<24x8xf32> -> vector<24x8xf32>
    %c0_243 = arith.constant 0 : index
    %c0_244 = arith.constant 0 : index
    %244 = vector.load %arg12[%c0_243, %c0_244] : memref<1x8xf32, #tpu.memory_space<vmem>>, vector<1x8xf32>
    %245 = vector.broadcast %244 : vector<1x8xf32> to vector<24x8xf32>
    %246 = arith.addf %243, %245 : vector<24x8xf32>
    %cst_245 = arith.constant 0.000000e+00 : f32
    %247 = vector.broadcast %cst_245 : f32 to vector<24x8xf32>
    %248 = arith.maximumf %246, %247 : vector<24x8xf32>
    %249 = vector.shape_cast %248 : vector<24x8xf32> to vector<3x8x8xf32>
    %c0_246 = arith.constant 0 : index
    %c0_247 = arith.constant 0 : index
    %c0_248 = arith.constant 0 : index
    %250 = vector.load %arg17[%c0_246, %c0_247, %c0_248] : memref<3x8x8xf32, #tpu.memory_space<vmem>>, vector<3x8x8xf32>
    tpu.vector_store %arg17[%c0_246, %c0_247, %c0_248], %249 {strides = array<i32>} : memref<3x8x8xf32, #tpu.memory_space<vmem>>, vector<3x8x8xf32>,
    %c0_i32 = arith.constant 0 : i32
    %c3_i32 = arith.constant 3 : i32
    %251 = arith.addi %c0_i32, %c3_i32 : i32
    %c1_i32 = arith.constant 1 : i32
    scf.for %arg18 = %c0_i32 to %251 step %c1_i32  : i32 {
      %252 = arith.index_cast %arg18 : i32 to index
      %c0_250 = arith.constant 0 : index
      %c0_251 = arith.constant 0 : index
      %253 = vector.load %arg17[%252, %c0_250, %c0_251] : memref<3x8x8xf32, #tpu.memory_space<vmem>>, vector<1x3x8xf32>
      %254 = vector.shape_cast %253 : vector<1x3x8xf32> to vector<3x8xf32>
      %255 = tpu.transpose %254, [1, 0] : vector<3x8xf32> -> vector<8x3xf32>
      %c0_252 = arith.constant 0 : index
      %256 = arith.index_cast %arg18 : i32 to index
      %c0_253 = arith.constant 0 : index
      %c0_254 = arith.constant 0 : index
      %257 = vector.load %arg13[%c0_252, %256, %c0_253, %c0_254] : memref<1x3x8x3xf32, #tpu.memory_space<vmem>>, vector<1x1x8x3xf32>
      %258 = vector.shape_cast %257 : vector<1x1x8x3xf32> to vector<8x3xf32>
      %259 = vector.shape_cast %255 : vector<8x3xf32> to vector<1x1x8x3xf32>
      tpu.vector_store %arg13[%c0_252, %256, %c0_253, %c0_254], %259 {strides = array<i32>} : memref<1x3x8x3xf32, #tpu.memory_space<vmem>>, vector<1x1x8x3xf32>,
    }
    %c3_i32_249 = arith.constant 3 : i32
    return
  }
  func.func @transform_0(%arg0: i32) -> (i32, i32, i32) {
    %c0_i32 = arith.constant 0 : i32
    %c0_i32_0 = arith.constant 0 : i32
    %c0_i32_1 = arith.constant 0 : i32
    return %arg0, %c0_i32, %c0_i32_0 : i32, i32, i32
  }
  func.func @transform_1(%arg0: i32) -> (i32, i32, i32) {
    %c0_i32 = arith.constant 0 : i32
    %c0_i32_0 = arith.constant 0 : i32
    %c0_i32_1 = arith.constant 0 : i32
    return %arg0, %c0_i32, %c0_i32_0 : i32, i32, i32
  }
  func.func @transform_2(%arg0: i32) -> (i32, i32, i32) {
    %c0_i32 = arith.constant 0 : i32
    %c0_i32_0 = arith.constant 0 : i32
    %c0_i32_1 = arith.constant 0 : i32
    return %arg0, %c0_i32, %c0_i32_0 : i32, i32, i32
  }
  func.func @transform_3(%arg0: i32) -> (i32, i32, i32) {
    %c0_i32 = arith.constant 0 : i32
    %c0_i32_0 = arith.constant 0 : i32
    %c0_i32_1 = arith.constant 0 : i32
    return %arg0, %c0_i32, %c0_i32_0 : i32, i32, i32
  }
  func.func @transform_4(%arg0: i32) -> (i32, i32, i32) {
    %c0_i32 = arith.constant 0 : i32
    %c0_i32_0 = arith.constant 0 : i32
    %c0_i32_1 = arith.constant 0 : i32
    return %arg0, %c0_i32, %c0_i32_0 : i32, i32, i32
  }
  func.func @transform_5(%arg0: i32) -> (i32, i32, i32) {
    %c0_i32 = arith.constant 0 : i32
    %c0_i32_0 = arith.constant 0 : i32
    %c0_i32_1 = arith.constant 0 : i32
    return %arg0, %c0_i32, %c0_i32_0 : i32, i32, i32
  }
  func.func @transform_6(%arg0: i32) -> (i32, i32, i32) {
    %c0_i32 = arith.constant 0 : i32
    %c0_i32_0 = arith.constant 0 : i32
    %c0_i32_1 = arith.constant 0 : i32
    return %arg0, %c0_i32, %c0_i32_0 : i32, i32, i32
  }
  func.func @transform_7(%arg0: i32) -> (i32, i32, i32) {
    %c0_i32 = arith.constant 0 : i32
    %c0_i32_0 = arith.constant 0 : i32
    %c0_i32_1 = arith.constant 0 : i32
    return %arg0, %c0_i32, %c0_i32_0 : i32, i32, i32
  }
  func.func @transform_8(%arg0: i32) -> (i32, i32) {
    %c0_i32 = arith.constant 0 : i32
    %c0_i32_0 = arith.constant 0 : i32
    %c0_i32_1 = arith.constant 0 : i32
    return %c0_i32, %c0_i32_0 : i32, i32
  }
  func.func @transform_9(%arg0: i32) -> (i32, i32, i32) {
    %c0_i32 = arith.constant 0 : i32
    %c0_i32_0 = arith.constant 0 : i32
    %c0_i32_1 = arith.constant 0 : i32
    %c0_i32_2 = arith.constant 0 : i32
    return %c0_i32, %c0_i32_0, %c0_i32_1 : i32, i32, i32
  }
  func.func @transform_10(%arg0: i32) -> (i32, i32) {
    %c0_i32 = arith.constant 0 : i32
    %c0_i32_0 = arith.constant 0 : i32
    %c0_i32_1 = arith.constant 0 : i32
    return %c0_i32, %c0_i32_0 : i32, i32
  }
  func.func @transform_11(%arg0: i32) -> (i32, i32) {
    %c0_i32 = arith.constant 0 : i32
    %c0_i32_0 = arith.constant 0 : i32
    %c0_i32_1 = arith.constant 0 : i32
    return %c0_i32, %c0_i32_0 : i32, i32
  }
  func.func @transform_12(%arg0: i32) -> (i32, i32, i32, i32) {
    %c0_i32 = arith.constant 0 : i32
    %c0_i32_0 = arith.constant 0 : i32
    %c0_i32_1 = arith.constant 0 : i32
    %c0_i32_2 = arith.constant 0 : i32
    return %arg0, %c0_i32, %c0_i32_0, %c0_i32_1 : i32, i32, i32, i32
  }
}

</mosaic_0001>

<bundles_post_ra>
// kernel: tpu_custom_call.1
= control target key start
LH: loop header
LB: loop body
LE: loop exit
PB: predicated region body
PF: predicated region fallthrough
CT: control target
= control target key end

     0   :  { %s2754_s21 = smov 0   ;;  %s3470_s0 = inlined_call_operand.vmem [shape: f32[2,8,5], index: 0, kind: input, shape index: {}]   ;;  %s3471_s1 = inlined_call_operand.vmem [shape: f32[2,8,5], index: 1, kind: input, shape index: {}]   ;;  %s3472_s2 = inlined_call_operand.vmem [shape: f32[2,8,5], index: 2, kind: input, shape index: {}]   ;;  %s3473_s3 = inlined_call_operand.vmem [shape: f32[2,8,5], index: 3, kind: input, shape index: {}]   ;;  %s3474_s4 = inlined_call_operand.vmem [shape: f32[2,8,5], index: 4, kind: input, shape index: {}]   ;;  %s3475_s5 = inlined_call_operand.vmem [shape: f32[2,8,5], index: 5, kind: input, shape index: {}]   ;;  %s3476_s6 = inlined_call_operand.vmem [shape: f32[2,8,5], index: 6, kind: input, shape index: {}]   ;;  %s3477_s7 = inlined_call_operand.vmem [shape: f32[2,8,5], index: 7, kind: input, shape index: {}]   ;;  %s3478_s8 = inlined_call_operand.vmem [shape: f32[9,8], index: 8, kind: input, shape index: {}]   ;;  %s3479_s9 = inlined_call_operand.vmem [shape: f32[1,1,8], index: 9, kind: input, shape index: {}]   ;;  %s3480_s10 = inlined_call_operand.vmem [shape: f32[72,8], index: 10, kind: input, shape index: {}]   ;;  %s3481_s11 = inlined_call_operand.vmem [shape: f32[1,8], index: 11, kind: input, shape index: {}]   ;;  %s3482_s12 = inlined_call_operand.vmem [shape: f32[2,3,8,3], index: 12, kind: output, shape index: {}]  }
   0x1 LB: > { %s2531_s22 = sadd.s32 4294967295, %s2672_s21   ;;  %p2535_p0 = scmp.ge.s32.totalorder %s2672_s21, 1  ;;  %s2672_s21 = sphi %s2754_s21, %s22_s21  }
   0x2   : > { %p424_p1 = scmp.lt.s32.totalorder %s2672_s21, 3 }
   0x4   : > { %p425_p2 = pnand %p2535_p0, %p424_p1 }
   0x5   : > { %p493_p3 = scmp.lt.s32.totalorder (!%p425_p2), %s2531_s22, 1  ;;  %v531_v0 = vlaneseq (!%p425_p2)  ;;  %vm606_vm0 = vcmask (!%p425_p2), 60416   ;;  %vm2063_vm1 = vcmask (!%p425_p2), 59392   ;;  %s2680_s14 = smov (!%p425_p2), 32   ;;  %vm2685_vm2 = vmmov (!%p425_p2), 0  }
   0x6   : > { %428 = sbr.rel (%p425_p2) target bundleno = 894 (0x37e), region = 68  ;;  %s2681_s16 = smov (!%p425_p2), 24   ;;  %vm2082_vm3 = vcmask (!%p425_p2), 124992   ;;  %vm2101_vm4 = vcmask (!%p425_p2), 190592   ;;  %vm2121_vm5 = vcmask (!%p425_p2), 256192   ;;  %vm2141_vm6 = vcmask (!%p425_p2), 321792  }
   0x7   : > { %v532_v1 = vshrl.u32 (!%p425_p2), %v531_v0, 7  ;;  %s2688_s20 = smov (!%p425_p2), 64   ;;  %vm2160_vm7 = vcmask (!%p425_p2), 387392   ;;  %vm2180_vm8 = vcmask (!%p425_p2), 452992   ;;  %vm2200_vm9 = vcmask (!%p425_p2), 518592  }
   0x8   : > { %vm2219_vm10 = vcmask (!%p425_p2), 584192   ;;  %vm2242_vm11 = vcmask (!%p425_p2), 588800   ;;  %vm2335_vm12 = vcmask (!%p425_p2), 64512  }
   0x9   : > { %v2764_v2 = vsub.s32 (!%p425_p2), 2, %v532_v1  ;;  %v2766_v3 = vsub.s32 (!%p425_p2), 3, %v532_v1  ;;  %v2791_v10 = vsub.s32 (!%p425_p2), 4, %v532_v1  ;;  %v2793_v11 = vsub.s32 (!%p425_p2), 0, %v532_v1 }
   0xa   : > { %v2799_v16 = vsub.s32 (!%p425_p2), 5, %v532_v1  ;;  %v2801_v17 = vsub.s32 (!%p425_p2), 1, %v532_v1  ;;  %v2807_v22 = vsub.s32 (!%p425_p2), 6, %v532_v1 }
   0xd   : > { %s3484_s22 = smov (!%p493_p3, %s2531_s22), 1 }
   0xe   : > { %s2762_s23 = sshll.u32 %s3484_s22, 3  ;;  %s2633_s24 = smul.u32 24, %s3484_s22 }
   0xf   : > { %s2772_s27 = scalar_lea.vmem %s3472_s2, %s2762_s23  ;;  %s2778_s30 = scalar_lea.vmem %s3470_s0, %s2762_s23 }
  0x10   : > { %s2783_s15 = scalar_lea.vmem %s3482_s12, %s2633_s24  ;;  %v1285_v4 = vld [vmem:[%s2772_s27] sm:$0x7f]  ;;  %s2813_s18 = scalar_lea.vmem %s3471_s1, %s2762_s23 }
  0x11   : > { %v530_v5 = vld [vmem:[%s2778_s30] sm:$0x7f]  ;;  %v1303_v6 = vrot.slane %v1285_v4, %v2764_v2  ;;  %v1310_v8 = vrot.slane %v1285_v4, %v2766_v3  ;;  %v1317_v12 = vrot.slane %v1285_v4, %v2791_v10  ;;  %v1289_v13 = vrot.slane %v1285_v4, %v2793_v11  ;;  %s2819_s22 = scalar_lea.vmem %s3473_s3, %s2762_s23  ;;  %s2857_s26 = scalar_lea.vmem %s3474_s4, %s2762_s23 }
  0x12   : > { %v555_v7 = vrot.slane %v530_v5, %v2766_v3  ;;  %v548_v9 = vrot.slane %v530_v5, %v2764_v2  ;;  %v562_v14 = vrot.slane %v530_v5, %v2791_v10  ;;  %v534_v15 = vrot.slane %v530_v5, %v2793_v11  ;;  %v614_v25 = vld [vmem:[%s2813_s18] sm:$0x7f]  ;;  %s2863_s13 = scalar_lea.vmem %s3476_s6, %s2762_s23  ;;  %s516_s17 = scalar_lea.vmem %s3475_s5, %s2762_s23 }
  0x13   : > { %1305 = vbcast.lane.b32.xlu0 %v1303_v6, 256  ;;  %v569_v18 = vrot.slane %v530_v5, %v2799_v16  ;;  %v541_v19 = vrot.slane %v530_v5, %v2801_v17  ;;  %v1324_v20 = vrot.slane %v1285_v4, %v2799_v16  ;;  %v1296_v21 = vrot.slane %v1285_v4, %v2801_v17  ;;  %v1368_v26 = vld [vmem:[%s2819_s22] sm:$0x7f]  ;;  %s524_s24 = scalar_lea.vmem %s3477_s7, %s2762_s23  ;;  %s2683_s23 = smov 40  }
  0x14   : > { %557 = vbcast.lane.b32.xlu1 %v555_v7, 256  ;;  %v1331_v23 = vrot.slane %v1285_v4, %v2807_v22  ;;  %v576_v24 = vrot.slane %v530_v5, %v2807_v22  ;;  %v632_v27 = vrot.slane %v614_v25, %v2764_v2  ;;  %v1386_v28 = vrot.slane %v1368_v26, %v2764_v2  ;;  %v697_v41 = vld [vmem:[%s2772_s27] sm:$0x7f] }
  0x15   : > { %v1393_v29 = vrot.slane %v1368_v26, %v2766_v3  ;;  %v639_v30 = vrot.slane %v614_v25, %v2766_v3  ;;  %v1400_v31 = vrot.slane %v1368_v26, %v2791_v10  ;;  %v1372_v32 = vrot.slane %v1368_v26, %v2793_v11  ;;  %v1451_v42 = vld [vmem:[%s2778_s30] sm:$0x7f] }
  0x16   : > { %v646_v33 = vrot.slane %v614_v25, %v2791_v10  ;;  %v618_v34 = vrot.slane %v614_v25, %v2793_v11  ;;  %v653_v35 = vrot.slane %v614_v25, %v2799_v16  ;;  %v625_v36 = vrot.slane %v614_v25, %v2801_v17  ;;  %v780_v57 = vld [vmem:[%s2857_s26] sm:$0x7f] }
  0x17   : > { %550 = vbcast.lane.b32.xlu0 %v548_v9, 256  ;;  %v1407_v37 = vrot.slane %v1368_v26, %v2799_v16  ;;  %v1379_v38 = vrot.slane %v1368_v26, %v2801_v17  ;;  %v1414_v39 = vrot.slane %v1368_v26, %v2807_v22  ;;  %v660_v40 = vrot.slane %v614_v25, %v2807_v22  ;;  %v1541_v58 = vld [vmem:[%s2863_s13] sm:$0x7f] }
  0x18   : > { %1312 = vbcast.lane.b32.xlu1 %v1310_v8, 256  ;;  %v715_v43 = vrot.slane %v697_v41, %v2764_v2  ;;  %v1471_v44 = vrot.slane %v1451_v42, %v2764_v2  ;;  %v1479_v45 = vrot.slane %v1451_v42, %v2766_v3  ;;  %v722_v46 = vrot.slane %v697_v41, %v2766_v3 }
  0x19   : > { %v1487_v47 = vrot.slane %v1451_v42, %v2791_v10  ;;  %v1455_v48 = vrot.slane %v1451_v42, %v2793_v11  ;;  %v729_v49 = vrot.slane %v697_v41, %v2791_v10  ;;  %v701_v50 = vrot.slane %v697_v41, %v2793_v11 }
  0x1a   : > { %v736_v51 = vrot.slane %v697_v41, %v2799_v16  ;;  %v708_v52 = vrot.slane %v697_v41, %v2801_v17  ;;  %v1495_v53 = vrot.slane %v1451_v42, %v2799_v16  ;;  %v1463_v54 = vrot.slane %v1451_v42, %v2801_v17 }
  0x1b   : > { %1291 = vbcast.lane.b32.xlu0 %v1289_v13, 256  ;;  %v1503_v55 = vrot.slane %v1451_v42, %v2807_v22  ;;  %v743_v56 = vrot.slane %v697_v41, %v2807_v22  ;;  %v798_v59 = vrot.slane %v780_v57, %v2764_v2  ;;  %v1559_v60 = vrot.slane %v1541_v58, %v2764_v2  ;;  %v2891_v13 = vld [vmem:[%s516_s17] sm:$0x7f] }
  0x1c   : > { %1319 = vbcast.lane.b32.xlu1 %v1317_v12, 256  ;;  %v1566_v61 = vrot.slane %v1541_v58, %v2766_v3  ;;  %v805_v62 = vrot.slane %v780_v57, %v2766_v3  ;;  %v1573_v63 = vrot.slane %v1541_v58, %v2791_v10  ;;  %v1545_v0 = vrot.slane %v1541_v58, %v2793_v11 }
  0x1d   : > { %v812_v1 = vrot.slane %v780_v57, %v2791_v10  ;;  %v784_v4 = vrot.slane %v780_v57, %v2793_v11  ;;  %v819_v5 = vrot.slane %v780_v57, %v2799_v16  ;;  %v791_v6 = vrot.slane %v780_v57, %v2801_v17 }
  0x1e   : > { %v1580_v7 = vrot.slane %v1541_v58, %v2799_v16  ;;  %v1552_v8 = vrot.slane %v1541_v58, %v2801_v17  ;;  %v1587_v9 = vrot.slane %v1541_v58, %v2807_v22  ;;  %v826_v12 = vrot.slane %v780_v57, %v2807_v22 }
  0x1f   : > { %536 = vbcast.lane.b32.xlu0 %v534_v15, 256  ;;  %v881_v15 = vrot.slane %v2891_v13, %v2764_v2 }
  0x20   : > { %564 = vbcast.lane.b32.xlu1 %v562_v14, 256  ;;  %v2893_v14 = vld [vmem:[%s524_s24] sm:$0x7f] }
  0x23   : > { %543 = vbcast.lane.b32.xlu0 %v541_v19, 256  ;;  %v2902_v19 = vld [vmem:[%s3478_s8] ss:$0 sm:$0xff] }
  0x24   : > { %571 = vbcast.lane.b32.xlu1 %v569_v18, 256  ;;  %v1642_v18 = vrot.slane %v2893_v14, %v2764_v2 }
  0x27   : > { %1298 = vbcast.lane.b32.xlu0 %v1296_v21, 256  ;;  %v888_v21 = vrot.slane %v2891_v13, %v2766_v3 }
  0x28   : > { %1326 = vbcast.lane.b32.xlu1 %v1324_v20, 256  ;;  %v1649_v20 = vrot.slane %v2893_v14, %v2766_v3 }
  0x2b   : > { %578 = vbcast.lane.b32.xlu0 %v576_v24, 256 }
  0x2c   : > { %1333 = vbcast.lane.b32.xlu1 %v1331_v23, 256  ;;  %v2911_v23 = vld [vmem:[%s3479_s9] ss:$0 sm:$0xff] }
  0x2f   : > { %1388 = vbcast.lane.b32.xlu0 %v1386_v28, 256  ;;  %v1656_v28 = vrot.slane %v2893_v14, %v2791_v10 }
  0x30   : > { %634 = vbcast.lane.b32.xlu1 %v632_v27, 256 }
  0x33   : > { %641 = vbcast.lane.b32.xlu0 %v639_v30, 256 }
  0x34   : > { %1395 = vbcast.lane.b32.xlu1 %v1393_v29, 256  ;;  %v1628_v29 = vrot.slane %v2893_v14, %v2793_v11 }
  0x37   : > { %1374 = vbcast.lane.b32.xlu0 %v1372_v32, 256 }
  0x38   : > { %1402 = vbcast.lane.b32.xlu1 %v1400_v31, 256 }
  0x3b   : > { %620 = vbcast.lane.b32.xlu0 %v618_v34, 256 }
  0x3c   : > { %648 = vbcast.lane.b32.xlu1 %v646_v33, 256 }
  0x3f   : > { %627 = vbcast.lane.b32.xlu0 %v625_v36, 256  ;;  %v895_v36 = vrot.slane %v2891_v13, %v2791_v10 }
  0x40   : > { %655 = vbcast.lane.b32.xlu1 %v653_v35, 256 }
  0x43   : > { %1381 = vbcast.lane.b32.xlu0 %v1379_v38, 256 }
  0x44   : > { %1409 = vbcast.lane.b32.xlu1 %v1407_v37, 256  ;;  %v867_v37 = vrot.slane %v2891_v13, %v2793_v11 }
  0x47   : > { %662 = vbcast.lane.b32.xlu0 %v660_v40, 256 }
  0x48   : > { %1416 = vbcast.lane.b32.xlu1 %v1414_v39, 256 }
  0x4b   : > { %1474 = vbcast.lane.b32.xlu0 %v1471_v44, 257  ;;  %v902_v44 = vrot.slane %v2891_v13, %v2799_v16 }
  0x4c   : > { %717 = vbcast.lane.b32.xlu1 %v715_v43, 256 }
  0x4f   : > { %724 = vbcast.lane.b32.xlu0 %v722_v46, 256 }
  0x50   : > { %1482 = vbcast.lane.b32.xlu1 %v1479_v45, 257  ;;  %v874_v45 = vrot.slane %v2891_v13, %v2801_v17 }
  0x53   : > { %1458 = vbcast.lane.b32.xlu0 %v1455_v48, 257 }
  0x54   : > { %1490 = vbcast.lane.b32.xlu1 %v1487_v47, 257 }
  0x57   : > { %703 = vbcast.lane.b32.xlu0 %v701_v50, 256 }
  0x58   : > { %731 = vbcast.lane.b32.xlu1 %v729_v49, 256 }
  0x5b   : > { %710 = vbcast.lane.b32.xlu0 %v708_v52, 256  ;;  %v1663_v52 = vrot.slane %v2893_v14, %v2799_v16 }
  0x5c   : > { %738 = vbcast.lane.b32.xlu1 %v736_v51, 256 }
  0x5f   : > { %1466 = vbcast.lane.b32.xlu0 %v1463_v54, 257 }
  0x60   : > { %1498 = vbcast.lane.b32.xlu1 %v1495_v53, 257  ;;  %v1635_v53 = vrot.slane %v2893_v14, %v2801_v17 }
  0x63   : > { %745 = vbcast.lane.b32.xlu0 %v743_v56, 256 }
  0x64   : > { %1506 = vbcast.lane.b32.xlu1 %v1503_v55, 257 }
  0x67   : > { %1561 = vbcast.lane.b32.xlu0 %v1559_v60, 256  ;;  %v1670_v60 = vrot.slane %v2893_v14, %v2807_v22 }
  0x68   : > { %800 = vbcast.lane.b32.xlu1 %v798_v59, 256 }
  0x6b   : > { %807 = vbcast.lane.b32.xlu0 %v805_v62, 256 }
  0x6c   : > { %1568 = vbcast.lane.b32.xlu1 %v1566_v61, 256  ;;  %v909_v61 = vrot.slane %v2891_v13, %v2807_v22 }
  0x6f   : > { %1547 = vbcast.lane.b32.xlu0 %v1545_v0, 256  ;;  %v2962_v0 = vld [vmem:[%s2863_s13] sm:$0x7f]  ;;  %s2679_s13 = smov 8  }
  0x70   : > { %1575 = vbcast.lane.b32.xlu1 %v1573_v63, 256 }
  0x73   : > { %786 = vbcast.lane.b32.xlu0 %v784_v4, 256 }
  0x74   : > { %814 = vbcast.lane.b32.xlu1 %v812_v1, 256  ;;  %v2965_v1 = vld [vmem:[%s2857_s26] sm:$0x7f]  ;;  %s2678_s26 = smov 16  }
  0x77   : > { %793 = vbcast.lane.b32.xlu0 %v791_v6, 256 }
  0x78   : > { %821 = vbcast.lane.b32.xlu1 %v819_v5, 256 }
  0x7b   : > { %1554 = vbcast.lane.b32.xlu0 %v1552_v8, 256  ;;  %v964_v8 = vrot.slane %v2962_v0, %v2764_v2 }
  0x7c   : > { %1582 = vbcast.lane.b32.xlu1 %v1580_v7, 256 }
  0x7f   : > { %828 = vbcast.lane.b32.xlu0 %v826_v12, 256 }
  0x80   : > { %1589 = vbcast.lane.b32.xlu1 %v1587_v9, 256  ;;  %v1727_v9 = vrot.slane %v2965_v1, %v2764_v2 }
  0x83   : > { %1644 = vbcast.lane.b32.xlu0 %v1642_v18, 256 }
  0x84   : > { %883 = vbcast.lane.b32.xlu1 %v881_v15, 256 }
  0x85   : > { %v1306_v24 = vpop.permute.xlu0 %1305 }
  0x86   : > { %v558_v25 = vpop.permute.xlu1 %557  ;;  %v1342_v26 = vmul.f32 %v2902_v19, %v1306_v24  ;;  %v1735_v24 = vrot.slane %v2965_v1, %v2766_v3 }
  0x87   : > { %v588_v27 = vmul.f32 %v2902_v19, %v558_v25  ;;  %890 = vbcast.lane.b32.xlu0 %v888_v21, 256  ;;  %v2984_v21 = vld [vmem:[%s3478_s8 + $0x1] ss:$0 sm:$0xff]  ;;  %v971_v25 = vrot.slane %v2962_v0, %v2766_v3 }
  0x88   : > { %1651 = vbcast.lane.b32.xlu1 %v1649_v20, 256  ;;  %v1356_v30 = vadd.f32 %v2911_v23, %v1342_v26 }
  0x89   : > { %v602_v31 = vadd.f32 %v2911_v23, %v588_v27  ;;  %v551_v33 = vpop.permute.xlu0 %550 }
  0x8a   : > { %v1313_v32 = vpop.permute.xlu1 %1312  ;;  %1363 = vst.msk [vmem:[#allocation3 + $0x8] sm:$0xf] %vm606_vm0, %v1356_v30  ;;  %v587_v35 = vmul.f32 %v2902_v19, %v551_v33  ;;  %v1743_v33 = vrot.slane %v2965_v1, %v2791_v10 }
  0x8b   : > { %610 = vst.msk [vmem:[#allocation2 + $0xc] sm:$0xf] %vm606_vm0, %v602_v31  ;;  %v1343_v34 = vmul.f32 %v2902_v19, %v1313_v32  ;;  %1630 = vbcast.lane.b32.xlu0 %v1628_v29, 256 }
  0x8c   : > { %1658 = vbcast.lane.b32.xlu1 %v1656_v28, 256  ;;  %v601_v39 = vadd.f32 %v2911_v23, %v587_v35 }
  0x8d   : > { %v1357_v38 = vadd.f32 %v2911_v23, %v1343_v34  ;;  %v1292_v41 = vpop.permute.xlu0 %1291 }
  0x8e   : > { %v1320_v40 = vpop.permute.xlu1 %1319  ;;  %609 = vst.msk [vmem:[#allocation2 + $0x8] sm:$0xf] %vm606_vm0, %v601_v39  ;;  %v1340_v43 = vmul.f32 %v2902_v19, %v1292_v41 }
  0x8f   : > { %1364 = vst.msk [vmem:[#allocation3 + $0xc] sm:$0xf] %vm606_vm0, %v1357_v38  ;;  %v1344_v42 = vmul.f32 %v2902_v19, %v1320_v40  ;;  %869 = vbcast.lane.b32.xlu0 %v867_v37, 256 }
  0x90   : > { %897 = vbcast.lane.b32.xlu1 %v895_v36, 256  ;;  %v1354_v47 = vadd.f32 %v2911_v23, %v1340_v43  ;;  %v950_v43 = vrot.slane %v2962_v0, %v2793_v11 }
  0x91   : > { %v1358_v46 = vadd.f32 %v2911_v23, %v1344_v42  ;;  %v537_v49 = vpop.permute.xlu0 %536  ;;  %v1432_v32 = vld [vmem:[#allocation3 + $0x8] sm:$0xf]  ;;  %v978_v42 = vrot.slane %v2962_v0, %v2791_v10 }
  0x92   : > { %v565_v48 = vpop.permute.xlu1 %564  ;;  %1361 = vst.msk [vmem:[#allocation3] sm:$0xf] %vm606_vm0, %v1354_v47  ;;  %v585_v51 = vmul.f32 %v2902_v19, %v537_v49  ;;  %v679_v41 = vld [vmem:[#allocation2 + $0xc] sm:$0xf] }
  0x93   : > { %1365 = vst.msk [vmem:[#allocation3 + $0x10] sm:$0xf] %vm606_vm0, %v1358_v46  ;;  %v589_v50 = vmul.f32 %v2902_v19, %v565_v48  ;;  %876 = vbcast.lane.b32.xlu0 %v874_v45, 256 }
  0x94   : > { %904 = vbcast.lane.b32.xlu1 %v902_v44, 256  ;;  %v599_v55 = vadd.f32 %v2911_v23, %v585_v51 }
  0x95   : > { %v603_v54 = vadd.f32 %v2911_v23, %v589_v50  ;;  %v544_v57 = vpop.permute.xlu0 %543  ;;  %v678_v31 = vld [vmem:[#allocation2 + $0x8] sm:$0xf] }
  0x96   : > { %v572_v56 = vpop.permute.xlu1 %571  ;;  %607 = vst.msk [vmem:[#allocation2] sm:$0xf] %vm606_vm0, %v599_v55  ;;  %v586_v59 = vmul.f32 %v2902_v19, %v544_v57  ;;  %v1433_v40 = vld [vmem:[#allocation3 + $0xc] sm:$0xf] }
  0x97   : > { %611 = vst.msk [vmem:[#allocation2 + $0x10] sm:$0xf] %vm606_vm0, %v603_v54  ;;  %v590_v58 = vmul.f32 %v2902_v19, %v572_v56  ;;  %1637 = vbcast.lane.b32.xlu0 %v1635_v53, 256  ;;  %v957_v53 = vrot.slane %v2962_v0, %v2801_v17 }
  0x98   : > { %1665 = vbcast.lane.b32.xlu1 %v1663_v52, 256  ;;  %v600_v63 = vadd.f32 %v2911_v23, %v586_v59  ;;  %v985_v52 = vrot.slane %v2962_v0, %v2799_v16 }
  0x99   : > { %v604_v62 = vadd.f32 %v2911_v23, %v590_v58  ;;  %v1299_v5 = vpop.permute.xlu0 %1298  ;;  %v1430_v51 = vld [vmem:[#allocation3] sm:$0xf] }
  0x9a   : > { %v1327_v4 = vpop.permute.xlu1 %1326  ;;  %608 = vst.msk [vmem:[#allocation2 + $0x4] sm:$0xf] %vm606_vm0, %v600_v63  ;;  %v1341_v7 = vmul.f32 %v2902_v19, %v1299_v5  ;;  %v1434_v50 = vld [vmem:[#allocation3 + $0x10] sm:$0xf]  ;;  %v1719_v63 = vrot.slane %v2965_v1, %v2801_v17 }
  0x9b   : > { %612 = vst.msk [vmem:[#allocation2 + $0x14] sm:$0xf] %vm606_vm0, %v604_v62  ;;  %v1345_v6 = vmul.f32 %v2902_v19, %v1327_v4  ;;  %911 = vbcast.lane.b32.xlu0 %v909_v61, 256  ;;  %v1751_v62 = vrot.slane %v2965_v1, %v2799_v16 }
  0x9c   : > { %1672 = vbcast.lane.b32.xlu1 %v1670_v60, 256  ;;  %v1355_v13 = vadd.f32 %v2911_v23, %v1341_v7 }
  0x9d   : > { %v1359_v12 = vadd.f32 %v2911_v23, %v1345_v6  ;;  %v579_v15 = vpop.permute.xlu0 %578  ;;  %v676_v61 = vld [vmem:[#allocation2] sm:$0xf] }
  0x9e   : > { %v1334_v14 = vpop.permute.xlu1 %1333  ;;  %1362 = vst.msk [vmem:[#allocation3 + $0x4] sm:$0xf] %vm606_vm0, %v1355_v13  ;;  %v591_v20 = vmul.f32 %v2902_v19, %v579_v15  ;;  %v680_v60 = vld [vmem:[#allocation2 + $0x10] sm:$0xf]  ;;  %v992_v15 = vrot.slane %v2962_v0, %v2807_v22 }
  0x9f   : > { %1366 = vst.msk [vmem:[#allocation3 + $0x14] sm:$0xf] %vm606_vm0, %v1359_v12  ;;  %v1346_v18 = vmul.f32 %v2902_v19, %v1334_v14  ;;  %1730 = vbcast.lane.b32.xlu0 %v1727_v9, 257  ;;  %v1759_v14 = vrot.slane %v2965_v1, %v2807_v22 }
  0xa0   : > { %966 = vbcast.lane.b32.xlu1 %v964_v8, 256  ;;  %v605_v27 = vadd.f32 %v2911_v23, %v591_v20 }
  0xa1   : > { %v1360_v26 = vadd.f32 %v2911_v23, %v1346_v18  ;;  %v1389_v29 = vpop.permute.xlu0 %1388  ;;  %v1711_v23 = vrot.slane %v2965_v1, %v2793_v11  ;;  %v677_v13 = vld [vmem:[#allocation2 + $0x4] sm:$0xf] }
  0xa2   : > { %v635_v28 = vpop.permute.xlu1 %634  ;;  %613 = vst.msk [vmem:[#allocation2 + $0x18] sm:$0xf] %vm606_vm0, %v605_v27  ;;  %v1425_v30 = vmul.f32 %v2984_v21, %v1389_v29  ;;  %v681_v12 = vld [vmem:[#allocation2 + $0x14] sm:$0xf] }
  0xa3   : > { %1367 = vst.msk [vmem:[#allocation3 + $0x18] sm:$0xf] %vm606_vm0, %v1360_v26  ;;  %v671_v19 = vmul.f32 %v2984_v21, %v635_v28  ;;  %973 = vbcast.lane.b32.xlu0 %v971_v25, 256  ;;  %v3036_v25 = vld [vmem:[%s2772_s27 + $0x1] sm:$0x7f] }
  0xa4   : > { %1738 = vbcast.lane.b32.xlu1 %v1735_v24, 257  ;;  %v1439_v35 = vadd.f32 %v1432_v32, %v1425_v30  ;;  %v3033_v24 = vld [vmem:[%s2778_s30 + $0x1] sm:$0x7f]  ;;  %v1815_v30 = vrot.slane %v3036_v25, %v2764_v2 }
  0xa5   : > { %v685_v34 = vadd.f32 %v678_v31, %v671_v19  ;;  %v642_v37 = vpop.permute.xlu0 %641  ;;  %v1431_v19 = vld [vmem:[#allocation3 + $0x4] sm:$0xf]  ;;  %v1047_v0 = vrot.slane %v3033_v24, %v2764_v2 }
  0xa6   : > { %v1396_v36 = vpop.permute.xlu1 %1395  ;;  %1446 = vst.msk [vmem:[#allocation3 + $0x8] sm:$0xf] %vm606_vm0, %v1439_v35  ;;  %v672_v39 = vmul.f32 %v2984_v21, %v642_v37  ;;  %v1435_v1 = vld [vmem:[#allocation3 + $0x14] sm:$0xf] }
  0xa7   : > { %692 = vst.msk [vmem:[#allocation2 + $0x8] sm:$0xf] %vm606_vm0, %v685_v34  ;;  %v1426_v38 = vmul.f32 %v2984_v21, %v1396_v36  ;;  %1714 = vbcast.lane.b32.xlu0 %v1711_v23, 257  ;;  %v3053_v36 = vld [vmem:[%s3478_s8 + $0x2] ss:$0 sm:$0xff] }
  0xa8   : > { %1746 = vbcast.lane.b32.xlu1 %v1743_v33, 257  ;;  %v686_v45 = vadd.f32 %v679_v41, %v672_v39  ;;  %v1822_v39 = vrot.slane %v3036_v25, %v2766_v3 }
  0xa9   : > { %v1440_v44 = vadd.f32 %v1433_v40, %v1426_v38  ;;  %v1375_v47 = vpop.permute.xlu0 %1374  ;;  %v682_v38 = vld [vmem:[#allocation2 + $0x18] sm:$0xf]  ;;  %v1054_v40 = vrot.slane %v3033_v24, %v2766_v3 }
  0xaa   : > { %v1403_v46 = vpop.permute.xlu1 %1402  ;;  %693 = vst.msk [vmem:[#allocation2 + $0xc] sm:$0xf] %vm606_vm0, %v686_v45  ;;  %v1423_v49 = vmul.f32 %v2984_v21, %v1375_v47  ;;  %v1436_v37 = vld [vmem:[#allocation3 + $0x18] sm:$0xf] }
  0xab   : > { %1447 = vst.msk [vmem:[#allocation3 + $0xc] sm:$0xf] %vm606_vm0, %v1440_v44  ;;  %v1427_v48 = vmul.f32 %v2984_v21, %v1403_v46  ;;  %952 = vbcast.lane.b32.xlu0 %v950_v43, 256 }
  0xac   : > { %980 = vbcast.lane.b32.xlu1 %v978_v42, 256  ;;  %v1437_v55 = vadd.f32 %v1430_v51, %v1423_v49  ;;  %v1801_v49 = vrot.slane %v3036_v25, %v2793_v11 }
  0xad   : > { %v1441_v54 = vadd.f32 %v1434_v50, %v1427_v48  ;;  %v621_v57 = vpop.permute.xlu0 %620  ;;  %v1522_v47 = vld [vmem:[#allocation3 + $0x8] sm:$0xf]  ;;  %v1829_v48 = vrot.slane %v3036_v25, %v2791_v10 }
  0xae   : > { %v649_v56 = vpop.permute.xlu1 %648  ;;  %1444 = vst.msk [vmem:[#allocation3] sm:$0xf] %vm606_vm0, %v1437_v55  ;;  %v669_v59 = vmul.f32 %v2984_v21, %v621_v57  ;;  %v761_v46 = vld [vmem:[#allocation2 + $0x8] sm:$0xf] }
  0xaf   : > { %1448 = vst.msk [vmem:[#allocation3 + $0x10] sm:$0xf] %vm606_vm0, %v1441_v54  ;;  %v673_v58 = vmul.f32 %v2984_v21, %v649_v56  ;;  %959 = vbcast.lane.b32.xlu0 %v957_v53, 256 }
  0xb0   : > { %987 = vbcast.lane.b32.xlu1 %v985_v52, 256  ;;  %v683_v5 = vadd.f32 %v676_v61, %v669_v59  ;;  %v1033_v59 = vrot.slane %v3033_v24, %v2793_v11 }
  0xb1   : > { %v687_v4 = vadd.f32 %v680_v60, %v673_v58  ;;  %v628_v7 = vpop.permute.xlu0 %627  ;;  %v762_v57 = vld [vmem:[#allocation2 + $0xc] sm:$0xf]  ;;  %v1061_v58 = vrot.slane %v3033_v24, %v2791_v10 }
  0xb2   : > { %v656_v6 = vpop.permute.xlu1 %655  ;;  %690 = vst.msk [vmem:[#allocation2] sm:$0xf] %vm606_vm0, %v683_v5  ;;  %v670_v9 = vmul.f32 %v2984_v21, %v628_v7  ;;  %v1523_v56 = vld [vmem:[#allocation3 + $0xc] sm:$0xf] }
  0xb3   : > { %694 = vst.msk [vmem:[#allocation2 + $0x10] sm:$0xf] %vm606_vm0, %v687_v4  ;;  %v674_v8 = vmul.f32 %v2984_v21, %v656_v6  ;;  %1722 = vbcast.lane.b32.xlu0 %v1719_v63, 257 }
  0xb4   : > { %1754 = vbcast.lane.b32.xlu1 %v1751_v62, 257  ;;  %v684_v20 = vadd.f32 %v677_v13, %v670_v9  ;;  %v1040_v9 = vrot.slane %v3033_v24, %v2801_v17 }
  0xb5   : > { %v688_v18 = vadd.f32 %v681_v12, %v674_v8  ;;  %v1382_v27 = vpop.permute.xlu0 %1381  ;;  %v1520_v7 = vld [vmem:[#allocation3] sm:$0xf]  ;;  %v1068_v8 = vrot.slane %v3033_v24, %v2799_v16 }
  0xb6   : > { %v1410_v26 = vpop.permute.xlu1 %1409  ;;  %691 = vst.msk [vmem:[#allocation2 + $0x4] sm:$0xf] %vm606_vm0, %v684_v20  ;;  %v1424_v29 = vmul.f32 %v2984_v21, %v1382_v27  ;;  %v1524_v6 = vld [vmem:[#allocation3 + $0x10] sm:$0xf] }
  0xb7   : > { %695 = vst.msk [vmem:[#allocation2 + $0x14] sm:$0xf] %vm606_vm0, %v688_v18  ;;  %v1428_v28 = vmul.f32 %v2984_v21, %v1410_v26  ;;  %994 = vbcast.lane.b32.xlu0 %v992_v15, 256 }
  0xb8   : > { %1762 = vbcast.lane.b32.xlu1 %v1759_v14, 257  ;;  %v1438_v32 = vadd.f32 %v1431_v19, %v1424_v29  ;;  %v1808_v29 = vrot.slane %v3036_v25, %v2801_v17 }
  0xb9   : > { %v1442_v31 = vadd.f32 %v1435_v1, %v1428_v28  ;;  %v663_v23 = vpop.permute.xlu0 %662  ;;  %v759_v27 = vld [vmem:[#allocation2] sm:$0xf]  ;;  %v1836_v28 = vrot.slane %v3036_v25, %v2799_v16 }
  0xba   : > { %v1417_v33 = vpop.permute.xlu1 %1416  ;;  %1445 = vst.msk [vmem:[#allocation3 + $0x4] sm:$0xf] %vm606_vm0, %v1438_v32  ;;  %v675_v35 = vmul.f32 %v2984_v21, %v663_v23  ;;  %v763_v26 = vld [vmem:[#allocation2 + $0x10] sm:$0xf] }
  0xbb   : > { %1449 = vst.msk [vmem:[#allocation3 + $0x14] sm:$0xf] %vm606_vm0, %v1442_v31  ;;  %v1429_v34 = vmul.f32 %v2984_v21, %v1417_v33  ;;  %1817 = vbcast.lane.b32.xlu0 %v1815_v30, 256 }
  0xbc   : > { %1049 = vbcast.lane.b32.xlu1 %v1047_v0, 256  ;;  %v689_v42 = vadd.f32 %v682_v38, %v675_v35  ;;  %v1075_v35 = vrot.slane %v3033_v24, %v2807_v22  ;;  %v3103_v38 = vld [vmem:[%s2819_s22 + $0x1] sm:$0x7f] }
  0xbd   : > { %v1443_v41 = vadd.f32 %v1436_v37, %v1429_v34  ;;  %v1475_v44 = vpop.permute.xlu0 %1474  ;;  %v760_v23 = vld [vmem:[#allocation2 + $0x4] sm:$0xf]  ;;  %v1843_v34 = vrot.slane %v3036_v25, %v2807_v22 }
  0xbe   : > { %v718_v43 = vpop.permute.xlu1 %717  ;;  %696 = vst.msk [vmem:[#allocation2 + $0x18] sm:$0xf] %vm606_vm0, %v689_v42  ;;  %v1515_v45 = vmul.f32 %v3053_v36, %v1475_v44  ;;  %v764_v33 = vld [vmem:[#allocation2 + $0x14] sm:$0xf]  ;;  %v3100_v37 = vld [vmem:[%s2813_s18 + $0x1] sm:$0x7f] }
  0xbf   : > { %1450 = vst.msk [vmem:[#allocation3 + $0x18] sm:$0xf] %vm606_vm0, %v1443_v41  ;;  %v754_v21 = vmul.f32 %v3053_v36, %v718_v43  ;;  %1056 = vbcast.lane.b32.xlu0 %v1054_v40, 256  ;;  %v1130_v24 = vrot.slane %v3100_v37, %v2764_v2  ;;  %s2684_s18 = smov 48  }
  0xc0   : > { %1824 = vbcast.lane.b32.xlu1 %v1822_v39, 256  ;;  %v1529_v51 = vadd.f32 %v1522_v47, %v1515_v45  ;;  %v1898_v45 = vrot.slane %v3103_v38, %v2764_v2 }
  0xc1   : > { %v768_v50 = vadd.f32 %v761_v46, %v754_v21  ;;  %v725_v53 = vpop.permute.xlu0 %724  ;;  %v1521_v21 = vld [vmem:[#allocation3 + $0x4] sm:$0xf] }
  0xc2   : > { %v1483_v52 = vpop.permute.xlu1 %1482  ;;  %1536 = vst.msk [vmem:[#allocation3 + $0x8] sm:$0xf] %vm606_vm0, %v1529_v51  ;;  %v755_v55 = vmul.f32 %v3053_v36, %v725_v53  ;;  %v1525_v25 = vld [vmem:[#allocation3 + $0x14] sm:$0xf] }
  0xc3   : > { %775 = vst.msk [vmem:[#allocation2 + $0x8] sm:$0xf] %vm606_vm0, %v768_v50  ;;  %v1516_v54 = vmul.f32 %v3053_v36, %v1483_v52  ;;  %1803 = vbcast.lane.b32.xlu0 %v1801_v49, 256  ;;  %v3120_v52 = vld [vmem:[%s3478_s8 + $0x3] ss:$0 sm:$0xff] }
  0xc4   : > { %1831 = vbcast.lane.b32.xlu1 %v1829_v48, 256  ;;  %v769_v61 = vadd.f32 %v762_v57, %v755_v55  ;;  %v1905_v55 = vrot.slane %v3103_v38, %v2766_v3 }
  0xc5   : > { %v1530_v60 = vadd.f32 %v1523_v56, %v1516_v54  ;;  %v1459_v63 = vpop.permute.xlu0 %1458  ;;  %v765_v54 = vld [vmem:[#allocation2 + $0x18] sm:$0xf]  ;;  %v1137_v56 = vrot.slane %v3100_v37, %v2766_v3 }
  0xc6   : > { %v1491_v62 = vpop.permute.xlu1 %1490  ;;  %776 = vst.msk [vmem:[#allocation2 + $0xc] sm:$0xf] %vm606_vm0, %v769_v61  ;;  %v1513_v5 = vmul.f32 %v3053_v36, %v1459_v63  ;;  %v1526_v53 = vld [vmem:[#allocation3 + $0x18] sm:$0xf] }
  0xc7   : > { %1537 = vst.msk [vmem:[#allocation3 + $0xc] sm:$0xf] %vm606_vm0, %v1530_v60  ;;  %v1517_v4 = vmul.f32 %v3053_v36, %v1491_v62  ;;  %1035 = vbcast.lane.b32.xlu0 %v1033_v59, 256 }
  0xc8   : > { %1063 = vbcast.lane.b32.xlu1 %v1061_v58, 256  ;;  %v1527_v13 = vadd.f32 %v1520_v7, %v1513_v5  ;;  %v1884_v5 = vrot.slane %v3103_v38, %v2793_v11 }
  0xc9   : > { %v1531_v12 = vadd.f32 %v1524_v6, %v1517_v4  ;;  %v704_v15 = vpop.permute.xlu0 %703  ;;  %v1605_v63 = vld [vmem:[#allocation3 + $0x8] sm:$0xf]  ;;  %v1912_v4 = vrot.slane %v3103_v38, %v2791_v10 }
  0xca   : > { %v732_v14 = vpop.permute.xlu1 %731  ;;  %1534 = vst.msk [vmem:[#allocation3] sm:$0xf] %vm606_vm0, %v1527_v13  ;;  %v752_v20 = vmul.f32 %v3053_v36, %v704_v15  ;;  %v844_v62 = vld [vmem:[#allocation2 + $0x8] sm:$0xf] }
  0xcb   : > { %1538 = vst.msk [vmem:[#allocation3 + $0x10] sm:$0xf] %vm606_vm0, %v1531_v12  ;;  %v756_v18 = vmul.f32 %v3053_v36, %v732_v14  ;;  %1042 = vbcast.lane.b32.xlu0 %v1040_v9, 256 }
  0xcc   : > { %1070 = vbcast.lane.b32.xlu1 %v1068_v8, 256  ;;  %v766_v19 = vadd.f32 %v759_v27, %v752_v20  ;;  %v1116_v20 = vrot.slane %v3100_v37, %v2793_v11 }
  0xcd   : > { %v770_v1 = vadd.f32 %v763_v26, %v756_v18  ;;  %v711_v30 = vpop.permute.xlu0 %710  ;;  %v845_v15 = vld [vmem:[#allocation2 + $0xc] sm:$0xf]  ;;  %v1144_v18 = vrot.slane %v3100_v37, %v2791_v10 }
  0xce   : > { %v739_v0 = vpop.permute.xlu1 %738  ;;  %773 = vst.msk [vmem:[#allocation2] sm:$0xf] %vm606_vm0, %v766_v19  ;;  %v753_v32 = vmul.f32 %v3053_v36, %v711_v30  ;;  %v1606_v14 = vld [vmem:[#allocation3 + $0xc] sm:$0xf] }
  0xcf   : > { %777 = vst.msk [vmem:[#allocation2 + $0x10] sm:$0xf] %vm606_vm0, %v770_v1  ;;  %v757_v31 = vmul.f32 %v3053_v36, %v739_v0  ;;  %1810 = vbcast.lane.b32.xlu0 %v1808_v29, 256 }
  0xd0   : > { %1838 = vbcast.lane.b32.xlu1 %v1836_v28, 256  ;;  %v767_v40 = vadd.f32 %v760_v23, %v753_v32  ;;  %v1123_v32 = vrot.slane %v3100_v37, %v2801_v17 }
  0xd1   : > { %v771_v39 = vadd.f32 %v764_v33, %v757_v31  ;;  %v1467_v42 = vpop.permute.xlu0 %1466  ;;  %v1603_v30 = vld [vmem:[#allocation3] sm:$0xf]  ;;  %v1151_v31 = vrot.slane %v3100_v37, %v2799_v16 }
  0xd2   : > { %v1499_v41 = vpop.permute.xlu1 %1498  ;;  %774 = vst.msk [vmem:[#allocation2 + $0x4] sm:$0xf] %vm606_vm0, %v767_v40  ;;  %v1514_v44 = vmul.f32 %v3053_v36, %v1467_v42  ;;  %v1607_v0 = vld [vmem:[#allocation3 + $0x10] sm:$0xf] }
  0xd3   : > { %778 = vst.msk [vmem:[#allocation2 + $0x14] sm:$0xf] %vm606_vm0, %v771_v39  ;;  %v1518_v43 = vmul.f32 %v3053_v36, %v1499_v41  ;;  %1077 = vbcast.lane.b32.xlu0 %v1075_v35, 256 }
  0xd4   : > { %1845 = vbcast.lane.b32.xlu1 %v1843_v34, 256  ;;  %v1528_v47 = vadd.f32 %v1521_v21, %v1514_v44  ;;  %v1891_v44 = vrot.slane %v3103_v38, %v2801_v17 }
  0xd5   : > { %v1532_v46 = vadd.f32 %v1525_v25, %v1518_v43  ;;  %v746_v49 = vpop.permute.xlu0 %745  ;;  %v842_v42 = vld [vmem:[#allocation2] sm:$0xf]  ;;  %v1919_v43 = vrot.slane %v3103_v38, %v2799_v16 }
  0xd6   : > { %v1507_v48 = vpop.permute.xlu1 %1506  ;;  %1535 = vst.msk [vmem:[#allocation3 + $0x4] sm:$0xf] %vm606_vm0, %v1528_v47  ;;  %v758_v51 = vmul.f32 %v3053_v36, %v746_v49  ;;  %v846_v41 = vld [vmem:[#allocation2 + $0x10] sm:$0xf] }
  0xd7   : > { %1539 = vst.msk [vmem:[#allocation3 + $0x14] sm:$0xf] %vm606_vm0, %v1532_v46  ;;  %v1519_v50 = vmul.f32 %v3053_v36, %v1507_v48  ;;  %1900 = vbcast.lane.b32.xlu0 %v1898_v45, 256 }
  0xd8   : > { %1132 = vbcast.lane.b32.xlu1 %v1130_v24, 256  ;;  %v772_v58 = vadd.f32 %v765_v54, %v758_v51  ;;  %v1158_v51 = vrot.slane %v3100_v37, %v2807_v22 }
  0xd9   : > { %v1533_v57 = vadd.f32 %v1526_v53, %v1519_v50  ;;  %v1562_v60 = vpop.permute.xlu0 %1561  ;;  %v843_v49 = vld [vmem:[#allocation2 + $0x4] sm:$0xf]  ;;  %v1926_v50 = vrot.slane %v3103_v38, %v2807_v22 }
  0xda   : > { %v801_v59 = vpop.permute.xlu1 %800  ;;  %779 = vst.msk [vmem:[#allocation2 + $0x18] sm:$0xf] %vm606_vm0, %v772_v58  ;;  %v1598_v61 = vmul.f32 %v3120_v52, %v1562_v60  ;;  %v847_v48 = vld [vmem:[#allocation2 + $0x14] sm:$0xf] }
  0xdb   : > { %1540 = vst.msk [vmem:[#allocation3 + $0x18] sm:$0xf] %vm606_vm0, %v1533_v57  ;;  %v837_v36 = vmul.f32 %v3120_v52, %v801_v59  ;;  %1139 = vbcast.lane.b32.xlu0 %v1137_v56, 256  ;;  %v3170_v56 = vld [vmem:[%s2778_s30 + $0x1] sm:$0x7f] }
  0xdc   : > { %1907 = vbcast.lane.b32.xlu1 %v1905_v55, 256  ;;  %v1612_v7 = vadd.f32 %v1605_v63, %v1598_v61  ;;  %v3167_v55 = vld [vmem:[%s2772_s27 + $0x1] sm:$0x7f]  ;;  %v1983_v61 = vrot.slane %v3170_v56, %v2764_v2 }
  0xdd   : > { %v851_v6 = vadd.f32 %v844_v62, %v837_v36  ;;  %v808_v9 = vpop.permute.xlu0 %807  ;;  %v1604_v36 = vld [vmem:[#allocation3 + $0x4] sm:$0xf]  ;;  %v1213_v37 = vrot.slane %v3167_v55, %v2764_v2  ;;  %v1991_v2 = vrot.slane %v3170_v56, %v2766_v3 }
  0xde   : > { %v1569_v8 = vpop.permute.xlu1 %1568  ;;  %1619 = vst.msk [vmem:[#allocation3 + $0x8] sm:$0xf] %vm606_vm0, %v1612_v7  ;;  %v838_v13 = vmul.f32 %v3120_v52, %v808_v9  ;;  %v1608_v38 = vld [vmem:[#allocation3 + $0x14] sm:$0xf] }
  0xdf   : > { %858 = vst.msk [vmem:[#allocation2 + $0x8] sm:$0xf] %vm606_vm0, %v851_v6  ;;  %v1599_v12 = vmul.f32 %v3120_v52, %v1569_v8  ;;  %1886 = vbcast.lane.b32.xlu0 %v1884_v5, 256  ;;  %v3187_v8 = vld [vmem:[%s3478_s8 + $0x4] ss:$0 sm:$0xff] }
  0xe0   : > { %1914 = vbcast.lane.b32.xlu1 %v1912_v4, 256  ;;  %v852_v27 = vadd.f32 %v845_v15, %v838_v13  ;;  %v1220_v13 = vrot.slane %v3167_v55, %v2766_v3  ;;  %v1967_v3 = vrot.slane %v3170_v56, %v2793_v11 }
  0xe1   : > { %v1613_v26 = vadd.f32 %v1606_v14, %v1599_v12  ;;  %v1548_v29 = vpop.permute.xlu0 %1547  ;;  %v848_v12 = vld [vmem:[#allocation2 + $0x18] sm:$0xf] }
  0xe2   : > { %v1576_v28 = vpop.permute.xlu1 %1575  ;;  %859 = vst.msk [vmem:[#allocation2 + $0xc] sm:$0xf] %vm606_vm0, %v852_v27  ;;  %v1596_v19 = vmul.f32 %v3120_v52, %v1548_v29  ;;  %v1609_v9 = vld [vmem:[#allocation3 + $0x18] sm:$0xf]  ;;  %v1999_v29 = vrot.slane %v3170_v56, %v2791_v10 }
  0xe3   : > { %1620 = vst.msk [vmem:[#allocation3 + $0xc] sm:$0xf] %vm606_vm0, %v1613_v26  ;;  %v1600_v1 = vmul.f32 %v3120_v52, %v1576_v28  ;;  %1118 = vbcast.lane.b32.xlu0 %v1116_v20, 256 }
  0xe4   : > { %1146 = vbcast.lane.b32.xlu1 %v1144_v18, 256  ;;  %v1610_v23 = vadd.f32 %v1603_v30, %v1596_v19 }
  0xe5   : > { %v1614_v33 = vadd.f32 %v1607_v0, %v1600_v1  ;;  %v787_v35 = vpop.permute.xlu0 %786  ;;  %v1688_v28 = vld [vmem:[#allocation3 + $0x8] sm:$0xf] }
  0xe6   : > { %v815_v34 = vpop.permute.xlu1 %814  ;;  %1617 = vst.msk [vmem:[#allocation3] sm:$0xf] %vm606_vm0, %v1610_v23  ;;  %v835_v40 = vmul.f32 %v3120_v52, %v787_v35  ;;  %v927_v27 = vld [vmem:[#allocation2 + $0x8] sm:$0xf]  ;;  %v1199_v35 = vrot.slane %v3167_v55, %v2793_v11  ;;  %v1206_v11 = vrot.slane %v3167_v55, %v2801_v17 }
  0xe7   : > { %1621 = vst.msk [vmem:[#allocation3 + $0x10] sm:$0xf] %vm606_vm0, %v1614_v33  ;;  %v839_v39 = vmul.f32 %v3120_v52, %v815_v34  ;;  %1125 = vbcast.lane.b32.xlu0 %v1123_v32, 256  ;;  %v1227_v34 = vrot.slane %v3167_v55, %v2791_v10  ;;  %v1234_v10 = vrot.slane %v3167_v55, %v2799_v16 }
  0xe8   : > { %1153 = vbcast.lane.b32.xlu1 %v1151_v31, 256  ;;  %v849_v21 = vadd.f32 %v842_v42, %v835_v40 }
  0xe9   : > { %v853_v25 = vadd.f32 %v846_v41, %v839_v39  ;;  %v794_v45 = vpop.permute.xlu0 %793  ;;  %v928_v23 = vld [vmem:[#allocation2 + $0xc] sm:$0xf] }
  0xea   : > { %v822_v24 = vpop.permute.xlu1 %821  ;;  %856 = vst.msk [vmem:[#allocation2] sm:$0xf] %vm606_vm0, %v849_v21  ;;  %v836_v47 = vmul.f32 %v3120_v52, %v794_v45  ;;  %v1689_v33 = vld [vmem:[#allocation3 + $0xc] sm:$0xf] }
  0xeb   : > { %860 = vst.msk [vmem:[#allocation2 + $0x10] sm:$0xf] %vm606_vm0, %v853_v25  ;;  %v840_v46 = vmul.f32 %v3120_v52, %v822_v24  ;;  %1893 = vbcast.lane.b32.xlu0 %v1891_v44, 256 }
  0xec   : > { %1921 = vbcast.lane.b32.xlu1 %v1919_v43, 256  ;;  %v850_v54 = vadd.f32 %v843_v49, %v836_v47 }
  0xed   : > { %v854_v53 = vadd.f32 %v847_v48, %v840_v46  ;;  %v1555_v58 = vpop.permute.xlu0 %1554  ;;  %v1686_v21 = vld [vmem:[#allocation3] sm:$0xf] }
  0xee   : > { %v1583_v57 = vpop.permute.xlu1 %1582  ;;  %857 = vst.msk [vmem:[#allocation2 + $0x4] sm:$0xf] %vm606_vm0, %v850_v54  ;;  %v1597_v60 = vmul.f32 %v3120_v52, %v1555_v58  ;;  %v1690_v25 = vld [vmem:[#allocation3 + $0x10] sm:$0xf]  ;;  %v1975_v54 = vrot.slane %v3170_v56, %v2801_v17  ;;  %v1241_v17 = vrot.slane %v3167_v55, %v2807_v22 }
  0xef   : > { %861 = vst.msk [vmem:[#allocation2 + $0x14] sm:$0xf] %vm606_vm0, %v854_v53  ;;  %v1601_v59 = vmul.f32 %v3120_v52, %v1583_v57  ;;  %1160 = vbcast.lane.b32.xlu0 %v1158_v51, 256  ;;  %v2007_v53 = vrot.slane %v3170_v56, %v2799_v16  ;;  %v2015_v16 = vrot.slane %v3170_v56, %v2807_v22 }
  0xf0   : > { %1928 = vbcast.lane.b32.xlu1 %v1926_v50, 256  ;;  %v1611_v63 = vadd.f32 %v1604_v36, %v1597_v60 }
  0xf1   : > { %v1615_v62 = vadd.f32 %v1608_v38, %v1601_v59  ;;  %v829_v5 = vpop.permute.xlu0 %828  ;;  %v925_v51 = vld [vmem:[#allocation2] sm:$0xf] }
  0xf2   : > { %v1590_v4 = vpop.permute.xlu1 %1589  ;;  %1618 = vst.msk [vmem:[#allocation3 + $0x4] sm:$0xf] %vm606_vm0, %v1611_v63  ;;  %v841_v7 = vmul.f32 %v3120_v52, %v829_v5  ;;  %v929_v50 = vld [vmem:[#allocation2 + $0x10] sm:$0xf] }
  0xf3   : > { %1622 = vst.msk [vmem:[#allocation3 + $0x14] sm:$0xf] %vm606_vm0, %v1615_v62  ;;  %v1602_v6 = vmul.f32 %v3120_v52, %v1590_v4  ;;  %1986 = vbcast.lane.b32.xlu0 %v1983_v61, 257 }
  0xf4   : > { %1215 = vbcast.lane.b32.xlu1 %v1213_v37, 256  ;;  %v855_v15 = vadd.f32 %v848_v12, %v841_v7 }
  0xf5   : > { %v1616_v14 = vadd.f32 %v1609_v9, %v1602_v6  ;;  %v1645_v20 = vpop.permute.xlu0 %1644  ;;  %v926_v61 = vld [vmem:[#allocation2 + $0x4] sm:$0xf] }
  0xf6   : > { %v884_v18 = vpop.permute.xlu1 %883  ;;  %862 = vst.msk [vmem:[#allocation2 + $0x18] sm:$0xf] %vm606_vm0, %v855_v15  ;;  %v1681_v26 = vmul.f32 %v3187_v8, %v1645_v20  ;;  %v930_v37 = vld [vmem:[#allocation2 + $0x14] sm:$0xf]  ;;  %v3244_v20 = vld [vmem:[%s3478_s8 + $0x5] ss:$0 sm:$0xff] }
  0xf7   : > { %1623 = vst.msk [vmem:[#allocation3 + $0x18] sm:$0xf] %vm606_vm0, %v1616_v14  ;;  %v920_v52 = vmul.f32 %v3187_v8, %v884_v18  ;;  %1222 = vbcast.lane.b32.xlu0 %v1220_v13, 256 }
  0xf8   : > { %1994 = vbcast.lane.b32.xlu1 %v1991_v2, 257  ;;  %v1695_v19 = vadd.f32 %v1688_v28, %v1681_v26 }
  0xf9   : > { %v934_v1 = vadd.f32 %v927_v27, %v920_v52  ;;  %v891_v30 = vpop.permute.xlu0 %890  ;;  %v1687_v12 = vld [vmem:[#allocation3 + $0x4] sm:$0xf] }
  0xfa   : > { %v1652_v0 = vpop.permute.xlu1 %1651  ;;  %1702 = vst.msk [vmem:[#allocation3 + $0x8] sm:$0xf] %vm606_vm0, %v1695_v19  ;;  %v921_v32 = vmul.f32 %v3187_v8, %v891_v30  ;;  %v1691_v9 = vld [vmem:[#allocation3 + $0x14] sm:$0xf] }
  0xfb   : > { %941 = vst.msk [vmem:[#allocation2 + $0x8] sm:$0xf] %vm606_vm0, %v934_v1  ;;  %v1682_v31 = vmul.f32 %v3187_v8, %v1652_v0  ;;  %1970 = vbcast.lane.b32.xlu0 %v1967_v3, 257 }
  0xfc   : > { %2002 = vbcast.lane.b32.xlu1 %v1999_v29, 257  ;;  %v935_v40 = vadd.f32 %v928_v23, %v921_v32 }
  0xfd   : > { %v1696_v39 = vadd.f32 %v1689_v33, %v1682_v31  ;;  %v1631_v42 = vpop.permute.xlu0 %1630  ;;  %v931_v18 = vld [vmem:[#allocation2 + $0x18] sm:$0xf] }
  0xfe   : > { %v1659_v41 = vpop.permute.xlu1 %1658  ;;  %942 = vst.msk [vmem:[#allocation2 + $0xc] sm:$0xf] %vm606_vm0, %v935_v40  ;;  %v1679_v44 = vmul.f32 %v3187_v8, %v1631_v42  ;;  %v1692_v15 = vld [vmem:[#allocation3 + $0x18] sm:$0xf] }
  0xff   : > { %1703 = vst.msk [vmem:[#allocation3 + $0xc] sm:$0xf] %vm606_vm0, %v1696_v39  ;;  %v1683_v43 = vmul.f32 %v3187_v8, %v1659_v41  ;;  %1201 = vbcast.lane.b32.xlu0 %v1199_v35, 256 }
 0x100   : > { %1229 = vbcast.lane.b32.xlu1 %v1227_v34, 256  ;;  %v1693_v45 = vadd.f32 %v1686_v21, %v1679_v44 }
 0x101   : > { %v1697_v24 = vadd.f32 %v1690_v25, %v1683_v43  ;;  %v870_v47 = vpop.permute.xlu0 %869  ;;  %v1778_v1 = vld [vmem:[#allocation3 + $0x8] sm:$0xf] }
 0x102   : > { %v898_v46 = vpop.permute.xlu1 %897  ;;  %1700 = vst.msk [vmem:[#allocation3] sm:$0xf] %vm606_vm0, %v1693_v45  ;;  %v918_v49 = vmul.f32 %v3187_v8, %v870_v47 }
 0x103   : > { %1704 = vst.msk [vmem:[#allocation3 + $0x10] sm:$0xf] %vm606_vm0, %v1697_v24  ;;  %v922_v48 = vmul.f32 %v3187_v8, %v898_v46  ;;  %1208 = vbcast.lane.b32.xlu0 %v1206_v11, 256 }
 0x104   : > { %1236 = vbcast.lane.b32.xlu1 %v1234_v10, 256  ;;  %v932_v58 = vadd.f32 %v925_v51, %v918_v49 }
 0x105   : > { %v936_v57 = vadd.f32 %v929_v50, %v922_v48  ;;  %v877_v60 = vpop.permute.xlu0 %876  ;;  %v1011_v34 = vld [vmem:[#allocation2 + $0xc] sm:$0xf] }
 0x106   : > { %v905_v59 = vpop.permute.xlu1 %904  ;;  %939 = vst.msk [vmem:[#allocation2] sm:$0xf] %vm606_vm0, %v932_v58  ;;  %v919_v36 = vmul.f32 %v3187_v8, %v877_v60  ;;  %v1779_v23 = vld [vmem:[#allocation3 + $0xc] sm:$0xf] }
 0x107   : > { %943 = vst.msk [vmem:[#allocation2 + $0x10] sm:$0xf] %vm606_vm0, %v936_v57  ;;  %v923_v38 = vmul.f32 %v3187_v8, %v905_v59  ;;  %1978 = vbcast.lane.b32.xlu0 %v1975_v54, 257 }
 0x108   : > { %2010 = vbcast.lane.b32.xlu1 %v2007_v53, 257  ;;  %v933_v63 = vadd.f32 %v926_v61, %v919_v36 }
 0x109   : > { %v937_v62 = vadd.f32 %v930_v37, %v923_v38  ;;  %v1638_v5 = vpop.permute.xlu0 %1637  ;;  %v1776_v25 = vld [vmem:[#allocation3] sm:$0xf] }
 0x10a   : > { %v1666_v4 = vpop.permute.xlu1 %1665  ;;  %940 = vst.msk [vmem:[#allocation2 + $0x4] sm:$0xf] %vm606_vm0, %v933_v63  ;;  %v1680_v7 = vmul.f32 %v3187_v8, %v1638_v5  ;;  %v1780_v44 = vld [vmem:[#allocation3 + $0x10] sm:$0xf] }
 0x10b   : > { %944 = vst.msk [vmem:[#allocation2 + $0x14] sm:$0xf] %vm606_vm0, %v937_v62  ;;  %v1684_v6 = vmul.f32 %v3187_v8, %v1666_v4  ;;  %1243 = vbcast.lane.b32.xlu0 %v1241_v17, 256 }
 0x10c   : > { %2018 = vbcast.lane.b32.xlu1 %v2015_v16, 257  ;;  %v1694_v2 = vadd.f32 %v1687_v12, %v1680_v7 }
 0x10d   : > { %v1698_v56 = vadd.f32 %v1691_v9, %v1684_v6  ;;  %v912_v22 = vpop.permute.xlu0 %911  ;;  %v1008_v48 = vld [vmem:[#allocation2] sm:$0xf] }
 0x10e   : > { %v1673_v13 = vpop.permute.xlu1 %1672  ;;  %1701 = vst.msk [vmem:[#allocation3 + $0x4] sm:$0xf] %vm606_vm0, %v1694_v2  ;;  %v924_v14 = vmul.f32 %v3187_v8, %v912_v22  ;;  %v1012_v47 = vld [vmem:[#allocation2 + $0x10] sm:$0xf]  ;;  %v3277_v2 = vld [vmem:[%s3478_s8 + $0x6] ss:$0 sm:$0xff] }
 0x10f   : > { %1705 = vst.msk [vmem:[#allocation3 + $0x14] sm:$0xf] %vm606_vm0, %v1698_v56  ;;  %v1685_v55 = vmul.f32 %v3187_v8, %v1673_v13  ;;  %v1010_v8 = vld [vmem:[#allocation2 + $0x8] sm:$0xf] }
 0x110   : > { %v938_v26 = vadd.f32 %v931_v18, %v924_v14 }
 0x111   : > { %v1699_v52 = vadd.f32 %v1692_v15, %v1685_v55  ;;  %v1731_v28 = vpop.permute.xlu0 %1730  ;;  %v1009_v59 = vld [vmem:[#allocation2 + $0x4] sm:$0xf] }
 0x112   : > { %v967_v27 = vpop.permute.xlu1 %966  ;;  %945 = vst.msk [vmem:[#allocation2 + $0x18] sm:$0xf] %vm606_vm0, %v938_v26  ;;  %v1771_v3 = vmul.f32 %v3244_v20, %v1731_v28  ;;  %v1013_v58 = vld [vmem:[#allocation2 + $0x14] sm:$0xf] }
 0x113   : > { %1706 = vst.msk [vmem:[#allocation3 + $0x18] sm:$0xf] %vm606_vm0, %v1699_v52  ;;  %v1003_v29 = vmul.f32 %v3244_v20, %v967_v27 }
 0x114   : > { %v1785_v0 = vadd.f32 %v1778_v1, %v1771_v3 }
 0x115   : > { %v1017_v19 = vadd.f32 %v1010_v8, %v1003_v29  ;;  %v974_v31 = vpop.permute.xlu0 %973  ;;  %v1777_v62 = vld [vmem:[#allocation3 + $0x4] sm:$0xf] }
 0x116   : > { %v1739_v30 = vpop.permute.xlu1 %1738  ;;  %1792 = vst.msk [vmem:[#allocation3 + $0x8] sm:$0xf] %vm606_vm0, %v1785_v0  ;;  %v1004_v33 = vmul.f32 %v3244_v20, %v974_v31  ;;  %v1781_v17 = vld [vmem:[#allocation3 + $0x14] sm:$0xf] }
 0x117   : > { %1024 = vst.msk [vmem:[#allocation2 + $0x8] sm:$0xf] %vm606_vm0, %v1017_v19  ;;  %v1772_v32 = vmul.f32 %v3244_v20, %v1739_v30 }
 0x118   : > { %v1018_v39 = vadd.f32 %v1011_v34, %v1004_v33 }
 0x119   : > { %v1786_v35 = vadd.f32 %v1779_v23, %v1772_v32  ;;  %v1715_v41 = vpop.permute.xlu0 %1714  ;;  %v1014_v56 = vld [vmem:[#allocation2 + $0x18] sm:$0xf] }
 0x11a   : > { %v1747_v40 = vpop.permute.xlu1 %1746  ;;  %1025 = vst.msk [vmem:[#allocation2 + $0xc] sm:$0xf] %vm606_vm0, %v1018_v39  ;;  %v1769_v43 = vmul.f32 %v3244_v20, %v1715_v41  ;;  %v1782_v12 = vld [vmem:[#allocation3 + $0x18] sm:$0xf] }
 0x11b   : > { %1793 = vst.msk [vmem:[#allocation3 + $0xc] sm:$0xf] %vm606_vm0, %v1786_v35  ;;  %v1773_v42 = vmul.f32 %v3244_v20, %v1747_v40 }
 0x11c   : > { %v1783_v10 = vadd.f32 %v1776_v25, %v1769_v43 }
 0x11d   : > { %v1787_v21 = vadd.f32 %v1780_v44, %v1773_v42  ;;  %v953_v24 = vpop.permute.xlu0 %952  ;;  %v1861_v52 = vld [vmem:[#allocation3 + $0x8] sm:$0xf] }
 0x11e   : > { %v981_v11 = vpop.permute.xlu1 %980  ;;  %1790 = vst.msk [vmem:[#allocation3] sm:$0xf] %vm606_vm0, %v1783_v10  ;;  %v1001_v46 = vmul.f32 %v3244_v20, %v953_v24 }
 0x11f   : > { %1794 = vst.msk [vmem:[#allocation3 + $0x10] sm:$0xf] %vm606_vm0, %v1787_v21  ;;  %v1005_v45 = vmul.f32 %v3244_v20, %v981_v11 }
 0x120   : > { %v1015_v50 = vadd.f32 %v1008_v48, %v1001_v46 }
 0x121   : > { %v1019_v49 = vadd.f32 %v1012_v47, %v1005_v45  ;;  %v960_v53 = vpop.permute.xlu0 %959  ;;  %v1094_v19 = vld [vmem:[#allocation2 + $0xc] sm:$0xf] }
 0x122   : > { %v988_v51 = vpop.permute.xlu1 %987  ;;  %1022 = vst.msk [vmem:[#allocation2] sm:$0xf] %vm606_vm0, %v1015_v50  ;;  %v1002_v57 = vmul.f32 %v3244_v20, %v960_v53  ;;  %v1862_v1 = vld [vmem:[#allocation3 + $0xc] sm:$0xf] }
 0x123   : > { %1026 = vst.msk [vmem:[#allocation2 + $0x10] sm:$0xf] %vm606_vm0, %v1019_v49  ;;  %v1006_v54 = vmul.f32 %v3244_v20, %v988_v51 }
 0x124   : > { %v1016_v38 = vadd.f32 %v1009_v59, %v1002_v57 }
 0x125   : > { %v1020_v60 = vadd.f32 %v1013_v58, %v1006_v54  ;;  %v1723_v37 = vpop.permute.xlu0 %1722  ;;  %v1859_v35 = vld [vmem:[#allocation3] sm:$0xf] }
 0x126   : > { %v1755_v36 = vpop.permute.xlu1 %1754  ;;  %1023 = vst.msk [vmem:[#allocation2 + $0x4] sm:$0xf] %vm606_vm0, %v1016_v38  ;;  %v1770_v16 = vmul.f32 %v3244_v20, %v1723_v37  ;;  %v1863_v34 = vld [vmem:[#allocation3 + $0x10] sm:$0xf] }
 0x127   : > { %1027 = vst.msk [vmem:[#allocation2 + $0x14] sm:$0xf] %vm606_vm0, %v1020_v60  ;;  %v1774_v61 = vmul.f32 %v3244_v20, %v1755_v36 }
 0x128   : > { %v1784_v4 = vadd.f32 %v1777_v62, %v1770_v16 }
 0x129   : > { %v1788_v63 = vadd.f32 %v1781_v17, %v1774_v61  ;;  %v995_v6 = vpop.permute.xlu0 %994  ;;  %v1091_v21 = vld [vmem:[#allocation2] sm:$0xf] }
 0x12a   : > { %v1763_v5 = vpop.permute.xlu1 %1762  ;;  %1791 = vst.msk [vmem:[#allocation3 + $0x4] sm:$0xf] %vm606_vm0, %v1784_v4  ;;  %v1007_v9 = vmul.f32 %v3244_v20, %v995_v6  ;;  %v1095_v25 = vld [vmem:[#allocation2 + $0x10] sm:$0xf]  ;;  %v3310_v4 = vld [vmem:[%s3478_s8 + $0x7] ss:$0 sm:$0xff] }
 0x12b   : > { %1795 = vst.msk [vmem:[#allocation3 + $0x14] sm:$0xf] %vm606_vm0, %v1788_v63  ;;  %v1775_v7 = vmul.f32 %v3244_v20, %v1763_v5  ;;  %v1093_v20 = vld [vmem:[#allocation2 + $0x8] sm:$0xf] }
 0x12c   : > { %v1021_v22 = vadd.f32 %v1014_v56, %v1007_v9 }
 0x12d   : > { %v1789_v13 = vadd.f32 %v1782_v12, %v1775_v7  ;;  %v1818_v14 = vpop.permute.xlu0 %1817  ;;  %v1092_v49 = vld [vmem:[#allocation2 + $0x4] sm:$0xf] }
 0x12e   : > { %v1050_v55 = vpop.permute.xlu1 %1049  ;;  %1028 = vst.msk [vmem:[#allocation2 + $0x18] sm:$0xf] %vm606_vm0, %v1021_v22  ;;  %v1854_v18 = vmul.f32 %v3277_v2, %v1818_v14  ;;  %v1096_v48 = vld [vmem:[#allocation2 + $0x14] sm:$0xf] }
 0x12f   : > { %1796 = vst.msk [vmem:[#allocation3 + $0x18] sm:$0xf] %vm606_vm0, %v1789_v13  ;;  %v1086_v15 = vmul.f32 %v3277_v2, %v1050_v55 }
 0x130   : > { %v1868_v27 = vadd.f32 %v1861_v52, %v1854_v18 }
 0x131   : > { %v1100_v26 = vadd.f32 %v1093_v20, %v1086_v15  ;;  %v1057_v29 = vpop.permute.xlu0 %1056  ;;  %v1860_v60 = vld [vmem:[#allocation3 + $0x4] sm:$0xf] }
 0x132   : > { %v1825_v28 = vpop.permute.xlu1 %1824  ;;  %1875 = vst.msk [vmem:[#allocation3 + $0x8] sm:$0xf] %vm606_vm0, %v1868_v27  ;;  %v1087_v8 = vmul.f32 %v3277_v2, %v1057_v29  ;;  %v1864_v59 = vld [vmem:[#allocation3 + $0x14] sm:$0xf] }
 0x133   : > { %1107 = vst.msk [vmem:[#allocation2 + $0x8] sm:$0xf] %vm606_vm0, %v1100_v26  ;;  %v1855_v3 = vmul.f32 %v3277_v2, %v1825_v28 }
 0x134   : > { %v1101_v30 = vadd.f32 %v1094_v19, %v1087_v8 }
 0x135   : > { %v1869_v0 = vadd.f32 %v1862_v1, %v1855_v3  ;;  %v1804_v32 = vpop.permute.xlu0 %1803  ;;  %v1097_v63 = vld [vmem:[#allocation2 + $0x18] sm:$0xf] }
 0x136   : > { %v1832_v31 = vpop.permute.xlu1 %1831  ;;  %1108 = vst.msk [vmem:[#allocation2 + $0xc] sm:$0xf] %vm606_vm0, %v1101_v30  ;;  %v1852_v23 = vmul.f32 %v3277_v2, %v1804_v32  ;;  %v1865_v62 = vld [vmem:[#allocation3 + $0x18] sm:$0xf] }
 0x137   : > { %1876 = vst.msk [vmem:[#allocation3 + $0xc] sm:$0xf] %vm606_vm0, %v1869_v0  ;;  %v1856_v33 = vmul.f32 %v3277_v2, %v1832_v31 }
 0x138   : > { %v1866_v40 = vadd.f32 %v1859_v35, %v1852_v23 }
 0x139   : > { %v1870_v39 = vadd.f32 %v1863_v34, %v1856_v33  ;;  %v1036_v42 = vpop.permute.xlu0 %1035  ;;  %v1944_v13 = vld [vmem:[#allocation3 + $0x8] sm:$0xf] }
 0x13a   : > { %v1064_v41 = vpop.permute.xlu1 %1063  ;;  %1873 = vst.msk [vmem:[#allocation3] sm:$0xf] %vm606_vm0, %v1866_v40  ;;  %v1084_v44 = vmul.f32 %v3277_v2, %v1036_v42 }
 0x13b   : > { %1877 = vst.msk [vmem:[#allocation3 + $0x10] sm:$0xf] %vm606_vm0, %v1870_v39  ;;  %v1088_v43 = vmul.f32 %v3277_v2, %v1064_v41 }
 0x13c   : > { %v1098_v11 = vadd.f32 %v1091_v21, %v1084_v44 }
 0x13d   : > { %v1102_v10 = vadd.f32 %v1095_v25, %v1088_v43  ;;  %v1043_v45 = vpop.permute.xlu0 %1042  ;;  %v1177_v26 = vld [vmem:[#allocation2 + $0xc] sm:$0xf] }
 0x13e   : > { %v1071_v24 = vpop.permute.xlu1 %1070  ;;  %1105 = vst.msk [vmem:[#allocation2] sm:$0xf] %vm606_vm0, %v1098_v11  ;;  %v1085_v47 = vmul.f32 %v3277_v2, %v1043_v45  ;;  %v1945_v52 = vld [vmem:[#allocation3 + $0xc] sm:$0xf] }
 0x13f   : > { %1109 = vst.msk [vmem:[#allocation2 + $0x10] sm:$0xf] %vm606_vm0, %v1102_v10  ;;  %v1089_v46 = vmul.f32 %v3277_v2, %v1071_v24 }
 0x140   : > { %v1099_v51 = vadd.f32 %v1092_v49, %v1085_v47 }
 0x141   : > { %v1103_v50 = vadd.f32 %v1096_v48, %v1089_v46  ;;  %v1811_v54 = vpop.permute.xlu0 %1810  ;;  %v1942_v0 = vld [vmem:[#allocation3] sm:$0xf] }
 0x142   : > { %v1839_v53 = vpop.permute.xlu1 %1838  ;;  %1106 = vst.msk [vmem:[#allocation2 + $0x4] sm:$0xf] %vm606_vm0, %v1099_v51  ;;  %v1853_v58 = vmul.f32 %v3277_v2, %v1811_v54  ;;  %v1946_v19 = vld [vmem:[#allocation3 + $0x10] sm:$0xf] }
 0x143   : > { %1110 = vst.msk [vmem:[#allocation2 + $0x14] sm:$0xf] %vm606_vm0, %v1103_v50  ;;  %v1857_v57 = vmul.f32 %v3277_v2, %v1839_v53 }
 0x144   : > { %v1867_v36 = vadd.f32 %v1860_v60, %v1853_v58 }
 0x145   : > { %v1871_v38 = vadd.f32 %v1864_v59, %v1857_v57  ;;  %v1078_v61 = vpop.permute.xlu0 %1077  ;;  %v1174_v39 = vld [vmem:[#allocation2] sm:$0xf] }
 0x146   : > { %v1846_v37 = vpop.permute.xlu1 %1845  ;;  %1874 = vst.msk [vmem:[#allocation3 + $0x4] sm:$0xf] %vm606_vm0, %v1867_v36  ;;  %v1090_v17 = vmul.f32 %v3277_v2, %v1078_v61  ;;  %v1178_v35 = vld [vmem:[#allocation2 + $0x10] sm:$0xf]  ;;  %v3343_v36 = vld [vmem:[%s3478_s8 + $0x8] ss:$0 sm:$0xff] }
 0x147   : > { %1878 = vst.msk [vmem:[#allocation3 + $0x14] sm:$0xf] %vm606_vm0, %v1871_v38  ;;  %v1858_v16 = vmul.f32 %v3277_v2, %v1846_v37  ;;  %v1176_v2 = vld [vmem:[#allocation2 + $0x8] sm:$0xf] }
 0x148   : > { %v1104_v6 = vadd.f32 %v1097_v63, %v1090_v17 }
 0x149   : > { %v1872_v5 = vadd.f32 %v1865_v62, %v1858_v16  ;;  %v1901_v9 = vpop.permute.xlu0 %1900  ;;  %v1175_v10 = vld [vmem:[#allocation2 + $0x4] sm:$0xf] }
 0x14a   : > { %v1133_v7 = vpop.permute.xlu1 %1132  ;;  %1111 = vst.msk [vmem:[#allocation2 + $0x18] sm:$0xf] %vm606_vm0, %v1104_v6  ;;  %v1937_v56 = vmul.f32 %v3310_v4, %v1901_v9  ;;  %v1179_v21 = vld [vmem:[#allocation2 + $0x14] sm:$0xf] }
 0x14b   : > { %1879 = vst.msk [vmem:[#allocation3 + $0x18] sm:$0xf] %vm606_vm0, %v1872_v5  ;;  %v1169_v12 = vmul.f32 %v3310_v4, %v1133_v7 }
 0x14c   : > { %v1951_v55 = vadd.f32 %v1944_v13, %v1937_v56 }
 0x14d   : > { %v1183_v22 = vadd.f32 %v1176_v2, %v1169_v12  ;;  %v1140_v15 = vpop.permute.xlu0 %1139  ;;  %v1943_v50 = vld [vmem:[#allocation3 + $0x4] sm:$0xf] }
 0x14e   : > { %v1908_v14 = vpop.permute.xlu1 %1907  ;;  %1958 = vst.msk [vmem:[#allocation3 + $0x8] sm:$0xf] %vm606_vm0, %v1951_v55  ;;  %v1170_v20 = vmul.f32 %v3310_v4, %v1140_v15  ;;  %v1947_v49 = vld [vmem:[#allocation3 + $0x14] sm:$0xf] }
 0x14f   : > { %1190 = vst.msk [vmem:[#allocation2 + $0x8] sm:$0xf] %vm606_vm0, %v1183_v22  ;;  %v1938_v18 = vmul.f32 %v3310_v4, %v1908_v14 }
 0x150   : > { %v1184_v28 = vadd.f32 %v1177_v26, %v1170_v20 }
 0x151   : > { %v1952_v27 = vadd.f32 %v1945_v52, %v1938_v18  ;;  %v1887_v3 = vpop.permute.xlu0 %1886  ;;  %v1180_v38 = vld [vmem:[#allocation2 + $0x18] sm:$0xf] }
 0x152   : > { %v1915_v29 = vpop.permute.xlu1 %1914  ;;  %1191 = vst.msk [vmem:[#allocation2 + $0xc] sm:$0xf] %vm606_vm0, %v1184_v28  ;;  %v1935_v1 = vmul.f32 %v3310_v4, %v1887_v3  ;;  %v1948_v60 = vld [vmem:[#allocation3 + $0x18] sm:$0xf] }
 0x153   : > { %1959 = vst.msk [vmem:[#allocation3 + $0xc] sm:$0xf] %vm606_vm0, %v1952_v27  ;;  %v1939_v8 = vmul.f32 %v3310_v4, %v1915_v29 }
 0x154   : > { %v1949_v31 = vadd.f32 %v1942_v0, %v1935_v1 }
 0x155   : > { %v1953_v30 = vadd.f32 %v1946_v19, %v1939_v8  ;;  %v1119_v33 = vpop.permute.xlu0 %1118  ;;  %v2034_v5 = vld [vmem:[#allocation3 + $0x8] sm:$0xf] }
 0x156   : > { %v1147_v32 = vpop.permute.xlu1 %1146  ;;  %1956 = vst.msk [vmem:[#allocation3] sm:$0xf] %vm606_vm0, %v1949_v31  ;;  %v1167_v34 = vmul.f32 %v3310_v4, %v1119_v33 }
 0x157   : > { %1960 = vst.msk [vmem:[#allocation3 + $0x10] sm:$0xf] %vm606_vm0, %v1953_v30  ;;  %v1171_v23 = vmul.f32 %v3310_v4, %v1147_v32 }
 0x158   : > { %v1181_v41 = vadd.f32 %v1174_v39, %v1167_v34 }
 0x159   : > { %v1185_v40 = vadd.f32 %v1178_v35, %v1171_v23  ;;  %v1126_v43 = vpop.permute.xlu0 %1125  ;;  %v1260_v14 = vld [vmem:[#allocation2 + $0xc] sm:$0xf] }
 0x15a   : > { %v1154_v42 = vpop.permute.xlu1 %1153  ;;  %1188 = vst.msk [vmem:[#allocation2] sm:$0xf] %vm606_vm0, %v1181_v41  ;;  %v1168_v25 = vmul.f32 %v3310_v4, %v1126_v43  ;;  %v2035_v55 = vld [vmem:[#allocation3 + $0xc] sm:$0xf] }
 0x15b   : > { %1192 = vst.msk [vmem:[#allocation2 + $0x10] sm:$0xf] %vm606_vm0, %v1185_v40  ;;  %v1172_v44 = vmul.f32 %v3310_v4, %v1154_v42 }
 0x15c   : > { %v1182_v24 = vadd.f32 %v1175_v10, %v1168_v25 }
 0x15d   : > { %v1186_v11 = vadd.f32 %v1179_v21, %v1172_v44  ;;  %v1894_v46 = vpop.permute.xlu0 %1893  ;;  %v2032_v8 = vld [vmem:[#allocation3] sm:$0xf] }
 0x15e   : > { %v1922_v45 = vpop.permute.xlu1 %1921  ;;  %1189 = vst.msk [vmem:[#allocation2 + $0x4] sm:$0xf] %vm606_vm0, %v1182_v24  ;;  %v1936_v48 = vmul.f32 %v3310_v4, %v1894_v46  ;;  %v2036_v3 = vld [vmem:[#allocation3 + $0x10] sm:$0xf] }
 0x15f   : > { %1193 = vst.msk [vmem:[#allocation2 + $0x14] sm:$0xf] %vm606_vm0, %v1186_v11  ;;  %v1940_v47 = vmul.f32 %v3310_v4, %v1922_v45 }
 0x160   : > { %v1950_v53 = vadd.f32 %v1943_v50, %v1936_v48 }
 0x161   : > { %v1954_v51 = vadd.f32 %v1947_v49, %v1940_v47  ;;  %v1161_v57 = vpop.permute.xlu0 %1160  ;;  %v1257_v35 = vld [vmem:[#allocation2] sm:$0xf] }
 0x162   : > { %v1929_v54 = vpop.permute.xlu1 %1928  ;;  %1957 = vst.msk [vmem:[#allocation3 + $0x4] sm:$0xf] %vm606_vm0, %v1950_v53  ;;  %v1173_v59 = vmul.f32 %v3310_v4, %v1161_v57  ;;  %v1261_v33 = vld [vmem:[#allocation2 + $0x10] sm:$0xf]  ;;  %v2227_v53 = vld [vmem:[%s3480_s10 + $0x8] sm:$0xff] }
 0x163   : > { %1961 = vst.msk [vmem:[#allocation3 + $0x14] sm:$0xf] %vm606_vm0, %v1954_v51  ;;  %v1941_v58 = vmul.f32 %v3310_v4, %v1929_v54  ;;  %v1259_v4 = vld [vmem:[#allocation2 + $0x8] sm:$0xf]  ;;  %v2226_v51 = vld [vmem:[%s3480_s10] sm:$0xff] }
 0x164   : > { %v1187_v61 = vadd.f32 %v1180_v38, %v1173_v59  ;;  %v2612_v59 = vpack.c.bf16 %v2227_v53, %v2226_v51 }
 0x165   : > { %v1955_v37 = vadd.f32 %v1948_v60, %v1941_v58  ;;  %v1987_v17 = vpop.permute.xlu0 %1986  ;;  %v1258_v46 = vld [vmem:[#allocation2 + $0x4] sm:$0xf]  ;;  %v2682_v58 = vmov 0.0|0.0  }
 0x166   : > { %v1216_v16 = vpop.permute.xlu1 %1215  ;;  %1194 = vst.msk [vmem:[#allocation2 + $0x18] sm:$0xf] %vm606_vm0, %v1187_v61  ;;  %v2027_v63 = vmul.f32 %v3343_v36, %v1987_v17  ;;  %v1262_v11 = vld [vmem:[#allocation2 + $0x14] sm:$0xf]  ;;  %2623 = vmatprep.subr.bf16.mxu1 %v2682_v58  ;;  %2611 = vmatprep.subr.bf16.mxu0 %v2682_v58 }
 0x167   : > { %1962 = vst.msk [vmem:[#allocation3 + $0x18] sm:$0xf] %vm606_vm0, %v1955_v37  ;;  %v1252_v62 = vmul.f32 %v3343_v36, %v1216_v16  ;;  %2628 = vmatpush3.bf16.msra.mxu1 %v2612_v59  ;;  %2613 = vmatpush3.bf16.msra.mxu0 %v2612_v59 }
 0x168   : > { %v2041_v7 = vadd.f32 %v2034_v5, %v2027_v63  ;;  %2624 = vmatprep.subr.bf16.mxu1 %v2682_v58  ;;  %2614 = vmatprep.subr.bf16.mxu0 %v2682_v58 }
 0x169   : > { %v1266_v6 = vadd.f32 %v1259_v4, %v1252_v62  ;;  %v1223_v12 = vpop.permute.xlu0 %1222  ;;  %v2033_v17 = vld [vmem:[#allocation3 + $0x4] sm:$0xf] }
 0x16a   : > { %v1995_v9 = vpop.permute.xlu1 %1994  ;;  %v2048_v2 = vmax.f32 %v2041_v7, 0.0  ;;  %v1253_v22 = vmul.f32 %v3343_v36, %v1223_v12  ;;  %v2037_v37 = vld [vmem:[#allocation3 + $0x14] sm:$0xf]  ;;  %v2229_v7 = vld [vmem:[%s3480_s10 + $0x18] sm:$0xff] }
 0x16b   : > { %v1273_v56 = vmax.f32 %v1266_v6, 0.0  ;;  %v2028_v13 = vmul.f32 %v3343_v36, %v1995_v9  ;;  %v2228_v6 = vld [vmem:[%s3480_s10 + $0x10] sm:$0xff] }
 0x16c   : > { %2055 = vst.msk [vmem:[#allocation3 + $0x8] sm:$0xf] %vm606_vm0, %v2048_v2  ;;  %v1267_v18 = vadd.f32 %v1260_v14, %v1253_v22 }
 0x16d   : > { %1280 = vst.msk [vmem:[#allocation2 + $0x8] sm:$0xf] %vm606_vm0, %v1273_v56  ;;  %v2042_v15 = vadd.f32 %v2035_v55, %v2028_v13  ;;  %v1971_v52 = vpop.permute.xlu0 %1970  ;;  %v2615_v56 = vpack.c.bf16 %v2229_v7, %v2228_v6 }
 0x16e   : > { %v2003_v20 = vpop.permute.xlu1 %2002  ;;  %v1274_v27 = vmax.f32 %v1267_v18, 0.0  ;;  %v2025_v29 = vmul.f32 %v3343_v36, %v1971_v52  ;;  %v2038_v22 = vld [vmem:[#allocation3 + $0x18] sm:$0xf] }
 0x16f   : > { %v2049_v26 = vmax.f32 %v2042_v15, 0.0  ;;  %v2029_v28 = vmul.f32 %v3343_v36, %v2003_v20  ;;  %v1263_v15 = vld [vmem:[#allocation2 + $0x18] sm:$0xf]  ;;  %2629 = vmatpush3.bf16.msra.mxu1 %v2615_v56  ;;  %2616 = vmatpush3.bf16.msra.mxu0 %v2615_v56 }
 0x170   : > { %1281 = vst.msk [vmem:[#allocation2 + $0xc] sm:$0xf] %vm606_vm0, %v1274_v27  ;;  %v2039_v19 = vadd.f32 %v2032_v8, %v2025_v29  ;;  %2625 = vmatprep.subr.bf16.mxu1 %v2682_v58  ;;  %v2231_v29 = vld [vmem:[%s3480_s10 + $0x28] sm:$0xff]  ;;  %2617 = vmatprep.subr.bf16.mxu0 %v2682_v58 }
 0x171   : > { %2056 = vst.msk [vmem:[#allocation3 + $0xc] sm:$0xf] %vm606_vm0, %v2049_v26  ;;  %v2043_v1 = vadd.f32 %v2036_v3, %v2029_v28  ;;  %v1202_v30 = vpop.permute.xlu0 %1201 }
 0x172   : > { %v1230_v0 = vpop.permute.xlu1 %1229  ;;  %v2046_v32 = vmax.f32 %v2039_v19, 0.0  ;;  %v1250_v34 = vmul.f32 %v3343_v36, %v1202_v30  ;;  %v2232_v30 = vld [vmem:[%s3480_s10 + $0x30] sm:$0xff] }
 0x173   : > { %v2050_v31 = vmax.f32 %v2043_v1, 0.0  ;;  %v1254_v23 = vmul.f32 %v3343_v36, %v1230_v0  ;;  %v2068_v40 = vld [vmem:[#allocation3 + $0x8] sm:$0x7] }
 0x174   : > { %v2087_v39 = vld [vmem:[#allocation2 + $0x9] sm:$0x7]  ;;  %2053 = vst.msk [vmem:[#allocation3] sm:$0xf] %vm606_vm0, %v2046_v32  ;;  %v1264_v42 = vadd.f32 %v1257_v35, %v1250_v34  ;;  %2075 = vrot.lane.b32.xlu0 %v2068_v40, %s2679_s13  ;;  %v2686_v34 = vmov 0.0   ;;  %v2234_v35 = vld [vmem:[%s3480_s10 + $0x40] sm:$0xff] }
 0x175   : > { %2057 = vst.msk [vmem:[#allocation3 + $0x10] sm:$0xf] %vm606_vm0, %v2050_v31  ;;  %v1268_v41 = vadd.f32 %v1261_v33, %v1254_v23  ;;  %2094 = vrot.lane.b32.xlu1 %v2087_v39, %s2678_s26  ;;  %v2061_v43 = vld [vmem:[#allocation2 + $0x8] sm:$0x7]  ;;  %v1209_v25 = vpop.permute.xlu0 %1208  ;;  %v2233_v31 = vld [vmem:[%s3480_s10 + $0x38] sm:$0xff]  ;;  %2605 = vmatprep.mubr.msk.f32.mxu1 %vm2685_vm2, %v2686_v34 }
 0x176   : > { %v1237_v44 = vpop.permute.xlu1 %1236  ;;  %2065 = vst.msk [vmem:[#allocation4 + $0x8] sm:$0x7] %vm2063_vm1, %v2061_v43  ;;  %v1271_v10 = vmax.f32 %v1264_v42, 0.0  ;;  %v1251_v45 = vmul.f32 %v3343_v36, %v1209_v25  ;;  %v2621_v32 = vpack.c.bf16 %v2233_v31, %v2232_v30  ;;  %2602 = vmatprep.mubr.msk.f32.mxu0 %vm2685_vm2, %v2686_v34  ;;  %v2165_v25 = vld [vmem:[#allocation2 + $0x8] sm:$0x7] }
 0x177   : > { %v1275_v21 = vmax.f32 %v1268_v41, 0.0  ;;  %v1255_v24 = vmul.f32 %v3343_v36, %v1237_v44  ;;  %v2107_v48 = vld [vmem:[#allocation2 + $0xc] sm:$0x7] }
 0x178   : > { %v2127_v47 = vld [vmem:[#allocation3 + $0xc] sm:$0x7]  ;;  %1278 = vst.msk [vmem:[#allocation2] sm:$0xf] %vm606_vm0, %v1271_v10  ;;  %v1265_v50 = vadd.f32 %v1258_v46, %v1251_v45  ;;  %2114 = vrot.lane.b32.xlu0 %v2107_v48, %s2681_s16  ;;  %v2146_v18 = vld [vmem:[#allocation2 + $0xd] sm:$0x7] }
 0x179   : > { %1282 = vst.msk [vmem:[#allocation2 + $0x10] sm:$0xf] %vm606_vm0, %v1275_v21  ;;  %v1269_v49 = vadd.f32 %v1262_v11, %v1255_v24  ;;  %2134 = vrot.lane.b32.xlu1 %v2127_v47, %s2680_s14  ;;  %v1979_v57 = vpop.permute.xlu0 %1978  ;;  %v2185_v10 = vld [vmem:[#allocation3 + $0x8] sm:$0x7]  ;;  %v2204_v24 = vld [vmem:[#allocation2 + $0x9] sm:$0x7] }
 0x17a   : > { %v2011_v54 = vpop.permute.xlu1 %2010  ;;  %v1272_v38 = vmax.f32 %v1265_v50, 0.0  ;;  %v2026_v16 = vmul.f32 %v3343_v36, %v1979_v57 }
 0x17b   : > { %v1276_v60 = vmax.f32 %v1269_v49, 0.0  ;;  %v2030_v61 = vmul.f32 %v3343_v36, %v2011_v54  ;;  %v2067_v63 = vld [vmem:[#allocation3] sm:$0x7] }
 0x17c   : > { %v2069_v62 = vld [vmem:[#allocation3 + $0x10] sm:$0x7]  ;;  %1279 = vst.msk [vmem:[#allocation2 + $0x4] sm:$0xf] %vm606_vm0, %v1272_v38  ;;  %v2040_v5 = vadd.f32 %v2033_v17, %v2026_v16  ;;  %2073 = vrot.lane.b32.xlu0 %v2067_v63, %s2679_s13 }
 0x17d   : > { %1283 = vst.msk [vmem:[#allocation2 + $0x14] sm:$0xf] %vm606_vm0, %v1276_v60  ;;  %v2044_v4 = vadd.f32 %v2037_v37, %v2030_v61  ;;  %2077 = vrot.lane.b32.xlu1 %v2069_v62, %s2679_s13  ;;  %v1244_v12 = vpop.permute.xlu0 %1243  ;;  %v2186_v39 = vld [vmem:[#allocation3 + $0x10] sm:$0x7] }
 0x17e   : > { %v2019_v9 = vpop.permute.xlu1 %2018  ;;  %v2047_v13 = vmax.f32 %v2040_v5, 0.0  ;;  %v1256_v14 = vmul.f32 %v3343_v36, %v1244_v12 }
 0x17f   : > { %v2051_v2 = vmax.f32 %v2044_v4, 0.0  ;;  %v2031_v55 = vmul.f32 %v3343_v36, %v2019_v9  ;;  %v2086_v20 = vld [vmem:[#allocation2 + $0x1] sm:$0x7] }
 0x180   : > { %2054 = vst.msk [vmem:[#allocation3 + $0x4] sm:$0xf] %vm606_vm0, %v2047_v13  ;;  %v1270_v26 = vadd.f32 %v1263_v15, %v1256_v14  ;;  %2153 = vrot.lane.b32.xlu0 %v2146_v18, %s2683_s23  ;;  %v2062_v27 = vld [vmem:[#allocation2 + $0x10] sm:$0x7]  ;;  %v2060_v28 = vld [vmem:[#allocation2] sm:$0x7] }
 0x181   : > { %2058 = vst.msk [vmem:[#allocation3 + $0x14] sm:$0xf] %vm606_vm0, %v2051_v2  ;;  %v2045_v52 = vadd.f32 %v2038_v22, %v2031_v55  ;;  %2092 = vrot.lane.b32.xlu1 %v2086_v20, %s2678_s26  ;;  %v2230_v36 = vld [vmem:[%s3480_s10 + $0x20] sm:$0xff]  ;;  %v2088_v19 = vld [vmem:[#allocation2 + $0x11] sm:$0x7] }
 0x182   : > { %2066 = vst.msk [vmem:[#allocation4 + $0x10] sm:$0x7] %vm2063_vm1, %v2062_v27  ;;  %2064 = vst.msk [vmem:[#allocation4] sm:$0x7] %vm2063_vm1, %v2060_v28  ;;  %v1277_v8 = vmax.f32 %v1270_v26, 0.0  ;;  %v2618_v1 = vpack.c.bf16 %v2231_v29, %v2230_v36 }
 0x183   : > { %v2052_v3 = vmax.f32 %v2045_v52, 0.0  ;;  %v2166_v0 = vld [vmem:[#allocation2 + $0x10] sm:$0x7]  ;;  %v2106_v23 = vld [vmem:[#allocation2 + $0x4] sm:$0x7] }
 0x184   : > { %1284 = vst.msk [vmem:[#allocation2 + $0x18] sm:$0xf] %vm606_vm0, %v1277_v8  ;;  %2096 = vrot.lane.b32.xlu0 %v2088_v19, %s2678_s26  ;;  %2630 = vmatpush3.bf16.msra.mxu1 %v2618_v1  ;;  %v2108_v33 = vld [vmem:[#allocation2 + $0x14] sm:$0x7]  ;;  %v2205_v42 = vld [vmem:[#allocation2 + $0x11] sm:$0x7] }
 0x185   : > { %2059 = vst.msk [vmem:[#allocation3 + $0x18] sm:$0xf] %vm606_vm0, %v2052_v3  ;;  %2173 = vrot.lane.b32.xlu1 %v2166_v0, %s2684_s18  ;;  %2619 = vmatpush3.bf16.msra.mxu0 %v2618_v1  ;;  %v2145_v43 = vld [vmem:[#allocation2 + $0x5] sm:$0x7]  ;;  %v2147_v44 = vld [vmem:[#allocation2 + $0x15] sm:$0x7] }
 0x186   : > { %2626 = vmatprep.subr.bf16.mxu1 %v2682_v58  ;;  %2620 = vmatprep.subr.bf16.mxu0 %v2682_v58  ;;  %v2565_v13 = vld [vmem:[%s3481_s11] ss:$0 sm:$0xff] }
 0x187   : > { %v2126_v40 = vld [vmem:[#allocation3 + $0x4] sm:$0x7] }
 0x188   : > { %2112 = vrot.lane.b32.xlu0 %v2106_v23, %s2681_s16  ;;  %2631 = vmatpush3.bf16.msra.mxu1 %v2621_v32  ;;  %v2128_v41 = vld [vmem:[#allocation3 + $0x14] sm:$0x7] }
 0x189   : > { %2116 = vrot.lane.b32.xlu1 %v2108_v33, %s2681_s16  ;;  %2627 = vmatprep.subr.mxu1 %v2686_v34  ;;  %s2687_s16 = smov 56  }
 0x18a   : > { %2622 = vmatpush3.bf16.msra.mxu0 %v2621_v32 }
 0x18b   : > { %2600 = vmatprep.subr.mxu0 %v2686_v34  ;;  %v2167_v21 = vld [vmem:[#allocation2 + $0x18] sm:$0x7] }
 0x18c   : > { %2193 = vrot.lane.b32.xlu0 %v2186_v39, %s2687_s16  ;;  %2632 = vmatpush3.msra.mxu1 %v2234_v35  ;;  %v2187_v11 = vld [vmem:[#allocation3 + $0x18] sm:$0x7]  ;;  %v2206_v45 = vld [vmem:[#allocation2 + $0x19] sm:$0x7] }
 0x18d   : > { %2132 = vrot.lane.b32.xlu1 %v2126_v40, %s2680_s14 }
 0x18e   : > { %2601 = vmatpush3.msra.mxu0 %v2234_v35 }
 0x190   : > { %2136 = vrot.lane.b32.xlu0 %v2128_v41, %s2680_s14 }
 0x191   : > { %2212 = vrot.lane.b32.xlu1 %v2205_v42, %s2688_s20 }
 0x194   : > { %2151 = vrot.lane.b32.xlu0 %v2145_v43, %s2683_s23 }
 0x195   : > { %2155 = vrot.lane.b32.xlu1 %v2147_v44, %s2683_s23  ;;  %s2674_s23 = smov 0  }
 0x198   : > { %2171 = vrot.lane.b32.xlu0 %v2165_v25, %s2684_s18 }
 0x199   : > { %2175 = vrot.lane.b32.xlu1 %v2167_v21, %s2684_s18 }
 0x19c   : > { %2191 = vrot.lane.b32.xlu0 %v2185_v10, %s2687_s16 }
 0x19d   : > { %2195 = vrot.lane.b32.xlu1 %v2187_v11, %s2687_s16 }
 0x1a0   : > { %2210 = vrot.lane.b32.xlu0 %v2204_v24, %s2688_s20 }
 0x1a1   : > { %2214 = vrot.lane.b32.xlu1 %v2206_v45, %s2688_s20 }
 0x1e6   : > { %v2076_v47 = vpop.permute.xlu0 %2075 }
 0x1e7   : > { %v2095_v46 = vpop.permute.xlu1 %2094  ;;  %2084 = vst.msk [vmem:[#allocation4 + $0x8] sm:$0x7] %vm2082_vm3, %v2076_v47 }
 0x1e8   : > { %2103 = vst.msk [vmem:[#allocation4 + $0x8] sm:$0x7] %vm2101_vm4, %v2095_v46 }
 0x1ea   : > { %v2115_v49 = vpop.permute.xlu0 %2114 }
 0x1eb   : > { %v2135_v48 = vpop.permute.xlu1 %2134  ;;  %2123 = vst.msk [vmem:[#allocation4 + $0x8] sm:$0x7] %vm2121_vm5, %v2115_v49 }
 0x1ec   : > { %2143 = vst.msk [vmem:[#allocation4 + $0x8] sm:$0x7] %vm2141_vm6, %v2135_v48 }
 0x1ee   : > { %v2074_v51 = vpop.permute.xlu0 %2073 }
 0x1ef   : > { %v2078_v50 = vpop.permute.xlu1 %2077  ;;  %2083 = vst.msk [vmem:[#allocation4] sm:$0x7] %vm2082_vm3, %v2074_v51 }
 0x1f0   : > { %2085 = vst.msk [vmem:[#allocation4 + $0x10] sm:$0x7] %vm2082_vm3, %v2078_v50 }
 0x1f2   : > { %v2154_v54 = vpop.permute.xlu0 %2153 }
 0x1f3   : > { %v2093_v53 = vpop.permute.xlu1 %2092  ;;  %2162 = vst.msk [vmem:[#allocation4 + $0x8] sm:$0x7] %vm2160_vm7, %v2154_v54 }
 0x1f4   : > { %2102 = vst.msk [vmem:[#allocation4] sm:$0x7] %vm2101_vm4, %v2093_v53 }
 0x1f6   : > { %v2097_v58 = vpop.permute.xlu0 %2096 }
 0x1f7   : > { %v2174_v57 = vpop.permute.xlu1 %2173  ;;  %2104 = vst.msk [vmem:[#allocation4 + $0x10] sm:$0x7] %vm2101_vm4, %v2097_v58 }
 0x1f8   : > { %2182 = vst.msk [vmem:[#allocation4 + $0x8] sm:$0x7] %vm2180_vm8, %v2174_v57 }
 0x1fa   : > { %v2113_v60 = vpop.permute.xlu0 %2112 }
 0x1fb   : > { %v2117_v59 = vpop.permute.xlu1 %2116  ;;  %2122 = vst.msk [vmem:[#allocation4] sm:$0x7] %vm2121_vm5, %v2113_v60 }
 0x1fc   : > { %2124 = vst.msk [vmem:[#allocation4 + $0x10] sm:$0x7] %vm2121_vm5, %v2117_v59 }
 0x1fe   : > { %v2194_v37 = vpop.permute.xlu0 %2193 }
 0x1ff   : > { %v2133_v38 = vpop.permute.xlu1 %2132  ;;  %2202 = vst.msk [vmem:[#allocation4 + $0x8] sm:$0x7] %vm2200_vm9, %v2194_v37 }
 0x200   : > { %2142 = vst.msk [vmem:[#allocation4] sm:$0x7] %vm2141_vm6, %v2133_v38 }
 0x202   : > { %v2137_v16 = vpop.permute.xlu0 %2136 }
 0x203   : > { %v2213_v61 = vpop.permute.xlu1 %2212  ;;  %2144 = vst.msk [vmem:[#allocation4 + $0x10] sm:$0x7] %vm2141_vm6, %v2137_v16 }
 0x204   : > { %2221 = vst.msk [vmem:[#allocation4 + $0x8] sm:$0x7] %vm2219_vm10, %v2213_v61 }
 0x206   : > { %v2152_v62 = vpop.permute.xlu0 %2151 }
 0x207   : > { %v2156_v17 = vpop.permute.xlu1 %2155  ;;  %2161 = vst.msk [vmem:[#allocation4] sm:$0x7] %vm2160_vm7, %v2152_v62 }
 0x208   : > { %2163 = vst.msk [vmem:[#allocation4 + $0x10] sm:$0x7] %vm2160_vm7, %v2156_v17 }
 0x20a   : > { %v2172_v4 = vpop.permute.xlu0 %2171 }
 0x20b   : > { %v2176_v63 = vpop.permute.xlu1 %2175  ;;  %v2224_v5 = vld [vmem:[#allocation4 + $0x8] sm:$0xff]  ;;  %2181 = vst.msk [vmem:[#allocation4] sm:$0x7] %vm2180_vm8, %v2172_v4 }
 0x20c   : > { %2183 = vst.msk [vmem:[#allocation4 + $0x10] sm:$0x7] %vm2180_vm8, %v2176_v63  ;;  %2606 = vmatmul.mubr.msk.f32.vlgmr.msra.gmra.mrb[0].mxu1 %vm2242_vm11, %v2224_v5 }
 0x20d   : > { %2608 = vmatprep.mubr.msk.f32.mxu1 %vm2685_vm2, %v2686_v34 }
 0x20e   : > { %v2192_v7 = vpop.permute.xlu0 %2191 }
 0x20f   : > { %v2196_v6 = vpop.permute.xlu1 %2195  ;;  %2201 = vst.msk [vmem:[#allocation4] sm:$0x7] %vm2200_vm9, %v2192_v7 }
 0x210   : > { %2203 = vst.msk [vmem:[#allocation4 + $0x10] sm:$0x7] %vm2200_vm9, %v2196_v6 }
 0x212   : > { %v2211_v12 = vpop.permute.xlu0 %2210 }
 0x213   : > { %v2215_v9 = vpop.permute.xlu1 %2214  ;;  %2220 = vst.msk [vmem:[#allocation4] sm:$0x7] %vm2219_vm10, %v2211_v12 }
 0x214   : > { %2222 = vst.msk [vmem:[#allocation4 + $0x10] sm:$0x7] %vm2219_vm10, %v2215_v9 }
 0x21a   : > { %v2223_v56 = vld [vmem:[#allocation4] sm:$0xff] }
 0x21b   : > { %v2225_v2 = vld [vmem:[#allocation4 + $0x10] sm:$0xff]  ;;  %2603 = vmatmul.mubr.msk.f32.vlgmr.msra.gmra.mrb[0].mxu0 %vm2242_vm11, %v2223_v56 }
 0x21c   : > { %2609 = vmatmul.mubr.msk.f32.gmra.mrb[2].mxu1 %vm2242_vm11, %v2225_v2 }
 0x2df   : > { %v2323_v22 = vpop.f32.mrb[0].mxu1 }
 0x2e0   : > { %v2324_v55 = vadd.f32 %v2565_v13, %v2323_v22  ;;  %v2607_v14 = vpop.f32.mrb[1].mxu1 }
 0x2e2   : > { %v2333_v15 = vmax.f32 %v2324_v55, 0.0 }
 0x2e4   : > { %2337 = vst.msk [vmem:[#allocation5 + $0x8] sm:$0xff] %vm2335_vm12, %v2333_v15 }
 0x2ee   : > { %v2318_v18 = vpop.f32.mrb[0].mxu0 }
 0x2ef   : > { %v2328_v20 = vpop.f32.mrb[2].mxu1  ;;  %v2319_v52 = vadd.f32 %v2565_v13, %v2318_v18  ;;  %v2604_v27 = vpop.f32.mrb[1].mxu0 }
 0x2f0   : > { %v2329_v26 = vadd.f32 %v2565_v13, %v2328_v20  ;;  %v2610_v28 = vpop.f32.mrb[3].mxu1 }
 0x2f1   : > { %v2332_v36 = vmax.f32 %v2319_v52, 0.0 }
 0x2f2   : > { %v2334_v29 = vmax.f32 %v2329_v26, 0.0 }
 0x2f3   : > { %2336 = vst.msk [vmem:[#allocation5] sm:$0xff] %vm2335_vm12, %v2332_v36 }
 0x2f4   : > { %2338 = vst.msk [vmem:[#allocation5 + $0x10] sm:$0xff] %vm2335_vm12, %v2334_v29 }
 0x2f5 LB: >> { %s2569_s25 = sshll.u32 %s2676_s23, 3  ;;  %vm2381_vm13 = vcmask 23552   ;;  %s2344_s23 = sadd.s32 1, %s2676_s23   ;;  %s2676_s23 = sphi %s2674_s23, %s2344_s23  }
 0x2f6   : >> { %s2346_s28 = scalar_lea.vmem [#allocation5], %s2569_s25  ;;  %s2380_s29 = scalar_lea.vmem %s2783_s15, %s2569_s25 }
 0x2f7   : >> { %p2341_p4 = scmp.ge.s32.totalorder %s2344_s23, 3  }
 0x2fb   : >> { %v2347_v3 = vld [vmem:[%s2346_s28] sm:$0x7] }
 0x2fc   : >> { %2348 = vxpose.xlu0.b32.start.end [1/1] (short) (narrow) %v2347_v3, 8 }
 0x377   : > { %2343 = sbr.rel (!%p2341_p4) target bundleno = 757 (0x2f5), region = 132 }
 0x37c   : >> { %v2364_v8 = vpop.trf.xlu0 }
 0x37d   : >> { %2382 = vst.msk [vmem:[%s2380_s29] sm:$0xff] %vm2381_vm13, %v2364_v8 }
 0x37e PF: > { %s22_s21 = sadd.s32 1, %s2672_s21  }
 0x37f   : > { %p19_p5 = scmp.ge.s32.totalorder %s22_s21, 4  }
 0x381   :  { %21 = sbr.rel (!%p19_p5) target bundleno = 1 (0x1), region = 143 }

</bundles_post_ra>
